<compile_context>
chip_gen: v7x
topology: tpu7x:2x2x1
jax: 0.10.0
libtpu: 0.0.40
codegen_flags: <defaults>
</compile_context>

<pallas_src>
import functools

import jax
import jax.numpy as jnp
from jax.experimental import pallas as pl
from jax.experimental.pallas import tpu as pltpu

EPS = 1e-5
NEG_SLOPE = 0.01  # torch.nn.LeakyReLU default


def _round_down(v, m):
    return (v // m) * m


def _pick_tile(total, align, cap):
    """Largest t <= cap with t % align == 0 and total % t == 0, else `total`."""
    if total <= cap:
        return total
    t = _round_down(cap, align)
    while t >= align:
        if total % t == 0:
            return t
        t -= align
    return total


def _pick_row_tile(total_rows, max_rows):
    """Output-row tile that is a multiple of 8 (or the full extent)."""
    max_rows = max(8, int(max_rows))
    if total_rows <= max_rows:
        return total_rows
    t = _round_down(max_rows, 8)
    while t >= 8:
        if total_rows % t == 0:
            return t
        t -= 8
    return 8  # cdiv fallback: tail block is padded / masked by Pallas


def _vmem_capacity_bytes():
    try:
        info = pltpu.get_tpu_info()
        for attr in ("vmem_capacity_bytes", "vmem_size_bytes", "vmem_bytes"):
            v = getattr(info, attr, None)
            if v:
                return int(v)
    except Exception:
        pass
    # conservative fallback (v7x per-TC size) so derived budgets are always safe
    return 64 * 1024 * 1024


# ---------------------------------------------------------------------------
# Pass 1: per-channel tile partials (sum, sum of squared deviations from the
# tile mean).  No resident accumulator -> both grid axes are "parallel".
# ---------------------------------------------------------------------------
def _stats_kernel(x_ref, sum_ref, m2_ref):
    x = x_ref[...].astype(jnp.float32)                   # (1, Cp, hw_t)
    s = jnp.sum(x, axis=2, keepdims=True)                # (1, Cp, 1)
    mu = s * (1.0 / x.shape[2])
    d = x - mu
    sum_ref[...] = s
    m2_ref[...] = jnp.sum(d * d, axis=2, keepdims=True)


def downsample_forward(x_nchw, gamma, beta, conv_w, conv_b, factor=2,
                       use_bf16_matmul=False):
    """_Downsample forward.  x_nchw: (N, C, H, W); gamma/beta: (C,);
    conv_w: (O, C, f, f) (PyTorch OIHW); conv_b: (O,).  Returns (N, O, H//f, W//f)."""
    N, C, H, W = x_nchw.shape
    O = int(conv_w.shape[0])
    f = int(factor)
    Ho, Wo = H // f, W // f
    HW = H * W
    H2, W2 = Ho * f, Wo * f
    itemsize = jnp.dtype(x_nchw.dtype).itemsize
    vmem_cap = _vmem_capacity_bytes()
    mm_dtype = jnp.bfloat16 if use_bf16_matmul else jnp.float32

    # ------------------------- pass 1: batch statistics -------------------------
    s_pack = 1
    if C < 8:
        cand = max(1, 8 // C)
        if HW % cand == 0:
            s_pack = cand                     # pack sublanes when C < 8
    Cp = C * s_pack
    L = HW // s_pack
    x_stats = x_nchw.reshape(N, Cp, L)        # free reshape of contiguous NCHW

    blk_target = min(8 << 20, int(vmem_cap * 0.4) // 3)   # ~6-8 MiB blocks
    hw_cap = max(128, blk_target // max(1, Cp * itemsize))
    hw_t = _pick_tile(L, 128, hw_cap)
    T = L // hw_t
    vmem_limit1 = int(min(int(vmem_cap * 0.9),
                          max(32 << 20, 2 * Cp * hw_t * itemsize + (4 << 20))))

    out_idx = lambda n, t: (n * T + t, 0, 0)
    sums, m2s = pl.pallas_call(
        _stats_kernel,
        grid=(N, T),
        in_specs=[pl.BlockSpec((1, Cp, hw_t), lambda n, t: (n, 0, t))],
        out_specs=[pl.BlockSpec((1, Cp, 1), out_idx),
                   pl.BlockSpec((1, Cp, 1), out_idx)],
        out_shape=[jax.ShapeDtypeStruct((N * T, Cp, 1), jnp.float32),
                   jax.ShapeDtypeStruct((N * T, Cp, 1), jnp.float32)],
        compiler_params=pltpu.CompilerParams(
            dimension_semantics=("parallel", "parallel"),
            vmem_limit_bytes=vmem_limit1),
    )(x_stats)

    # Chan parallel-variance combine on the tiny partials (XLA, numerically robust).
    n_chunks = N * T * s_pack
    cnt_chunk = float(hw_t)
    total_cnt = float(N * HW)
    sum_ck = jnp.moveaxis(sums.reshape(N * T, C, s_pack), 1, 0).reshape(C, n_chunks)
    m2_ck = jnp.moveaxis(m2s.reshape(N * T, C, s_pack), 1, 0).reshape(C, n_chunks)
    mean = jnp.sum(sum_ck, axis=1) / total_cnt
    mean_chunk = sum_ck / cnt_chunk
    m2 = jnp.sum(m2_ck, axis=1) + cnt_chunk * jnp.sum(
        jnp.square(mean_chunk - mean[:, None]), axis=1)
    var = jnp.maximum(m2 / total_cnt, 0.0)          # biased variance (BN training norm)

    scale = gamma.astype(jnp.float32) * jax.lax.rsqrt(var + EPS)
    shift = beta.astype(jnp.float32) - mean * scale
    # TODO(synk): running_mean / running_var momentum buffer updates not emitted.

    # --------------- pass 2: fused BN affine + LeakyReLU + strided conv ---------------
    xs = x_nchw
    if H2 != H or W2 != W:
        xs = x_nchw[:, :, :H2, :W2]           # rows/cols the strided conv never touches
    # free reshape: "row" ho holds input rows f*ho .. f*ho+f-1 back to back
    x4 = xs.reshape(N, C, Ho, f * W2)

    # (f*f, O, C): w_r[i*f + j][o, c] = conv_w[o, c, i, j]
    w_r = jnp.transpose(conv_w.astype(jnp.float32), (2, 3, 0, 1)
                        ).reshape(f * f, O, C).astype(mm_dtype)
    # 0/1 selection matrices: sel[j, w, wo] = 1 iff w == f*wo + j
    w_idx = jnp.arange(W2)[:, None]
    o_idx = f * jnp.arange(Wo)[None, :]
    sel = jnp.stack([(w_idx == o_idx + j) for j in range(f)], axis=0).astype(mm_dtype)
    scale_col = scale.reshape(C, 1)
    shift_col = shift.reshape(C, 1)
    bias_col = conv_b.astype(jnp.float32).reshape(O, 1)

    mm_size = 2 if use_bf16_matmul else 4
    resident2 = (f * f * O * C + f * W2 * Wo) * mm_size + (2 * C + O) * 4
    row_bytes = 2 * C * f * W2 * itemsize + 2 * O * Wo * itemsize
    budget2 = max(row_bytes, int(vmem_cap * 0.4) - resident2)
    Th = _pick_row_tile(Ho, min(32, max(1, budget2 // row_bytes)))
    if N == 1 and Th == Ho and Ho >= 16:
        Th = _pick_row_tile(Ho, max(8, Ho // 2))   # keep both v7x TensorCores busy
    grid_h = pl.cdiv(Ho, Th)
    vmem_need2 = (2 * C * Th * f * W2 * itemsize + 2 * O * Th * Wo * itemsize
                  + resident2 + (8 << 20))
    vmem_limit2 = int(min(int(vmem_cap * 0.9), max(32 << 20, vmem_need2)))

    def _fused_bn_act_conv_kernel(x_ref, w_ref, sel_ref, sc_ref, sh_ref, b_ref, o_ref):
        # x_ref: (1, C, Th, f*W2); o_ref: (1, O, Th, Wo); the rest are VMEM-resident.
        scale_b = jnp.broadcast_to(sc_ref[...], (C, W2))      # hoisted broadcasts
        shift_b = jnp.broadcast_to(sh_ref[...], (C, W2))
        bias_b = jnp.broadcast_to(b_ref[...], (O, Wo))
        wmats = [w_ref[k] for k in range(f * f)]              # (O, C) each
        sels = [sel_ref[j] for j in range(f)]                 # (W2, Wo) each
        for r in range(Th):                                   # static unroll over rows
            acc = bias_b
            for i in range(f):
                # input row f*ho + i, all W2 columns (contiguous static slice)
                xr = x_ref[0, :, r, i * W2:(i + 1) * W2].astype(jnp.float32)  # (C, W2)
                y = xr * scale_b + shift_b                    # BatchNorm affine (f32)
                y = jnp.maximum(y, NEG_SLOPE * y)             # LeakyReLU (single max)
                y = y.astype(mm_dtype)
                for j in range(f):
                    # stride-f column pick as a matmul -> (C, Wo)
                    t = jnp.dot(y, sels[j], preferred_element_type=jnp.float32)
                    acc = acc + jnp.dot(wmats[i * f + j], t.astype(mm_dtype),
                                        preferred_element_type=jnp.float32)
            o_ref[0, :, r, :] = acc.astype(o_ref.dtype)       # (O, Wo), true width O

    out = pl.pallas_call(
        _fused_bn_act_conv_kernel,
        grid=(N, grid_h),
        in_specs=[
            pl.BlockSpec((1, C, Th, f * W2), lambda n, h: (n, 0, h, 0)),
            pl.BlockSpec((f * f, O, C), lambda n, h: (0, 0, 0)),    # resident
            pl.BlockSpec((f, W2, Wo), lambda n, h: (0, 0, 0)),      # resident
            pl.BlockSpec((C, 1), lambda n, h: (0, 0)),              # resident
            pl.BlockSpec((C, 1), lambda n, h: (0, 0)),              # resident
            pl.BlockSpec((O, 1), lambda n, h: (0, 0)),              # resident
        ],
        out_specs=pl.BlockSpec((1, O, Th, Wo), lambda n, h: (n, 0, h, 0)),
        out_shape=jax.ShapeDtypeStruct((N, O, Ho, Wo), x_nchw.dtype),
        compiler_params=pltpu.CompilerParams(
            dimension_semantics=("parallel", "parallel"),
            vmem_limit_bytes=vmem_limit2),
    )(x4, w_r, sel, scale_col, shift_col, bias_col)
    return out


# ---------------------------------------------------------------------------
# Plain-JAX reference (in-script sanity check only)
# ---------------------------------------------------------------------------
def _reference(x, gamma, beta, conv_w, conv_b, factor):
    mean = jnp.mean(x, axis=(0, 2, 3), keepdims=True)
    var = jnp.var(x, axis=(0, 2, 3), keepdims=True)
    xhat = (x - mean) / jnp.sqrt(var + EPS)
    y = xhat * gamma.reshape(1, -1, 1, 1) + beta.reshape(1, -1, 1, 1)
    y = jnp.where(y >= 0, y, NEG_SLOPE * y)
    out = jax.lax.conv_general_dilated(
        y, conv_w, window_strides=(factor, factor), padding="VALID",
        dimension_numbers=("NCHW", "OIHW", "NCHW"))
    return out + conv_b.reshape(1, -1, 1, 1)


if __name__ == "__main__":
    N, C_in, H, W = 2, 4, 16, 16
    C_out, factor = 8, 2

    key = jax.random.PRNGKey(0)
    kx, kg, kb, kw, kc = jax.random.split(key, 5)

    x = jax.random.normal(kx, (N, C_in, H, W), dtype=jnp.float32)
    gamma = 1.0 + 0.1 * jax.random.normal(kg, (C_in,), dtype=jnp.float32)
    beta = 0.1 * jax.random.normal(kb, (C_in,), dtype=jnp.float32)
    conv_w = 0.1 * jax.random.normal(kw, (C_out, C_in, factor, factor),
                                     dtype=jnp.float32)
    conv_b = 0.1 * jax.random.normal(kc, (C_out,), dtype=jnp.float32)

    fwd = jax.jit(functools.partial(downsample_forward, factor=factor))
    out = jax.block_until_ready(fwd(x, gamma, beta, conv_w, conv_b))

    ref = _reference(x, gamma, beta, conv_w, conv_b, factor)
    assert out.shape == (N, C_out, H // factor, W // factor)
    assert jnp.allclose(out, ref, atol=1e-4, rtol=1e-4), \
        float(jnp.max(jnp.abs(out - ref)))

    print("KERNEL_OK")
</pallas_src>

<mosaic_0001>
module attributes {stable_mosaic.version = 11 : i64} {
  func.func @_stats_kernel(%arg0: i32, %arg1: i32, %arg2: memref<1x8x128xf32, #tpu.memory_space<vmem>>, %arg3: memref<1x8x1xf32, #tpu.memory_space<vmem>>, %arg4: memref<1x8x1xf32, #tpu.memory_space<vmem>>) attributes {dimension_semantics = [#tpu.dimension_semantics<parallel>, #tpu.dimension_semantics<parallel>], iteration_bounds = array<i64: 2, 1>, scalar_prefetch = 0 : i64, scratch_operands = 0 : i64, tpu.core_type = #tpu.core_type<tc>, window_params = [{transform_indices = @transform_0, window_bounds = array<i64: 1, 8, 128>}, {transform_indices = @transform_1, window_bounds = array<i64: 1, 8, 1>}, {transform_indices = @transform_2, window_bounds = array<i64: 1, 8, 1>}]} {
    %c0 = arith.constant 0 : index
    %c0_0 = arith.constant 0 : index
    %c0_1 = arith.constant 0 : index
    %0 = vector.load %arg2[%c0, %c0_0, %c0_1] : memref<1x8x128xf32, #tpu.memory_space<vmem>>, vector<1x8x128xf32>
    %cst = arith.constant dense<0.000000e+00> : vector<1x8xf32>
    %1 = vector.multi_reduction <add>, %0, %cst [2] : vector<1x8x128xf32> to vector<1x8xf32>
    %2 = vector.shape_cast %1 : vector<1x8xf32> to vector<1x8x1xf32>
    %cst_2 = arith.constant 7.812500e-03 : f32
    %3 = vector.broadcast %cst_2 : f32 to vector<1x8x1xf32>
    %4 = arith.mulf %2, %3 : vector<1x8x1xf32>
    %5 = vector.broadcast %4 : vector<1x8x1xf32> to vector<1x8x128xf32>
    %6 = arith.subf %0, %5 : vector<1x8x128xf32>
    %c0_3 = arith.constant 0 : index
    %c0_4 = arith.constant 0 : index
    %c0_5 = arith.constant 0 : index
    %7 = vector.load %arg3[%c0_3, %c0_4, %c0_5] : memref<1x8x1xf32, #tpu.memory_space<vmem>>, vector<1x8x1xf32>
    tpu.vector_store %arg3[%c0_3, %c0_4, %c0_5], %2 {strides = array<i32>} : memref<1x8x1xf32, #tpu.memory_space<vmem>>, vector<1x8x1xf32>,
    %8 = arith.mulf %6, %6 : vector<1x8x128xf32>
    %cst_6 = arith.constant dense<0.000000e+00> : vector<1x8xf32>
    %9 = vector.multi_reduction <add>, %8, %cst_6 [2] : vector<1x8x128xf32> to vector<1x8xf32>
    %10 = vector.shape_cast %9 : vector<1x8xf32> to vector<1x8x1xf32>
    %c0_7 = arith.constant 0 : index
    %c0_8 = arith.constant 0 : index
    %c0_9 = arith.constant 0 : index
    %11 = vector.load %arg4[%c0_7, %c0_8, %c0_9] : memref<1x8x1xf32, #tpu.memory_space<vmem>>, vector<1x8x1xf32>
    tpu.vector_store %arg4[%c0_7, %c0_8, %c0_9], %10 {strides = array<i32>} : memref<1x8x1xf32, #tpu.memory_space<vmem>>, vector<1x8x1xf32>,
    return
  }
  func.func @transform_0(%arg0: i32, %arg1: i32) -> (i32, i32, i32) {
    %c0_i32 = arith.constant 0 : i32
    %c0_i32_0 = arith.constant 0 : i32
    return %arg0, %c0_i32, %arg1 : i32, i32, i32
  }
  func.func @transform_1(%arg0: i32, %arg1: i32) -> (i32, i32, i32) {
    %c1_i32 = arith.constant 1 : i32
    %0 = arith.muli %arg0, %c1_i32 : i32
    %1 = arith.addi %0, %arg1 : i32
    %c0_i32 = arith.constant 0 : i32
    %c0_i32_0 = arith.constant 0 : i32
    %c0_i32_1 = arith.constant 0 : i32
    return %1, %c0_i32, %c0_i32_0 : i32, i32, i32
  }
  func.func @transform_2(%arg0: i32, %arg1: i32) -> (i32, i32, i32) {
    %c1_i32 = arith.constant 1 : i32
    %0 = arith.muli %arg0, %c1_i32 : i32
    %1 = arith.addi %0, %arg1 : i32
    %c0_i32 = arith.constant 0 : i32
    %c0_i32_0 = arith.constant 0 : i32
    %c0_i32_1 = arith.constant 0 : i32
    return %1, %c0_i32, %c0_i32_0 : i32, i32, i32
  }
}

module attributes {stable_mosaic.version = 11 : i64} {
  func.func @_fused_bn_act_conv_kernel(%arg0: i32, %arg1: i32, %arg2: memref<1x4x8x32xf32, #tpu.memory_space<vmem>>, %arg3: memref<4x8x4xf32, #tpu.memory_space<vmem>>, %arg4: memref<2x16x8xf32, #tpu.memory_space<vmem>>, %arg5: memref<4x1xf32, #tpu.memory_space<vmem>>, %arg6: memref<4x1xf32, #tpu.memory_space<vmem>>, %arg7: memref<8x1xf32, #tpu.memory_space<vmem>>, %arg8: memref<1x8x8x8xf32, #tpu.memory_space<vmem>>) attributes {dimension_semantics = [#tpu.dimension_semantics<parallel>, #tpu.dimension_semantics<parallel>], iteration_bounds = array<i64: 2, 1>, scalar_prefetch = 0 : i64, scratch_operands = 0 : i64, tpu.core_type = #tpu.core_type<tc>, window_params = [{transform_indices = @transform_0, window_bounds = array<i64: 1, 4, 8, 32>}, {pipeline_mode = #tpu.pipeline_mode<synchronous>, transform_indices = @transform_1, window_bounds = array<i64: 4, 8, 4>}, {pipeline_mode = #tpu.pipeline_mode<synchronous>, transform_indices = @transform_2, window_bounds = array<i64: 2, 16, 8>}, {pipeline_mode = #tpu.pipeline_mode<synchronous>, transform_indices = @transform_3, window_bounds = array<i64: 4, 1>}, {pipeline_mode = #tpu.pipeline_mode<synchronous>, transform_indices = @transform_4, window_bounds = array<i64: 4, 1>}, {pipeline_mode = #tpu.pipeline_mode<synchronous>, transform_indices = @transform_5, window_bounds = array<i64: 8, 1>}, {transform_indices = @transform_6, window_bounds = array<i64: 1, 8, 8, 8>}]} {
    %c0 = arith.constant 0 : index
    %c0_0 = arith.constant 0 : index
    %0 = vector.load %arg5[%c0, %c0_0] : memref<4x1xf32, #tpu.memory_space<vmem>>, vector<4x1xf32>
    %1 = vector.shape_cast %0 : vector<4x1xf32> to vector<4x1xf32>
    %2 = vector.broadcast %1 : vector<4x1xf32> to vector<4x16xf32>
    %c0_1 = arith.constant 0 : index
    %c0_2 = arith.constant 0 : index
    %3 = vector.load %arg6[%c0_1, %c0_2] : memref<4x1xf32, #tpu.memory_space<vmem>>, vector<4x1xf32>
    %4 = vector.shape_cast %3 : vector<4x1xf32> to vector<4x1xf32>
    %5 = vector.broadcast %4 : vector<4x1xf32> to vector<4x16xf32>
    %c0_3 = arith.constant 0 : index
    %c0_4 = arith.constant 0 : index
    %6 = vector.load %arg7[%c0_3, %c0_4] : memref<8x1xf32, #tpu.memory_space<vmem>>, vector<8x1xf32>
    %7 = vector.shape_cast %6 : vector<8x1xf32> to vector<8x1xf32>
    %8 = vector.broadcast %7 : vector<8x1xf32> to vector<8x8xf32>
    %c0_5 = arith.constant 0 : index
    %c0_6 = arith.constant 0 : index
    %c0_7 = arith.constant 0 : index
    %9 = vector.load %arg3[%c0_5, %c0_6, %c0_7] : memref<4x8x4xf32, #tpu.memory_space<vmem>>, vector<1x8x4xf32>
    %10 = vector.shape_cast %9 : vector<1x8x4xf32> to vector<8x4xf32>
    %c1 = arith.constant 1 : index
    %c0_8 = arith.constant 0 : index
    %c0_9 = arith.constant 0 : index
    %11 = vector.load %arg3[%c1, %c0_8, %c0_9] : memref<4x8x4xf32, #tpu.memory_space<vmem>>, vector<1x8x4xf32>
    %12 = vector.shape_cast %11 : vector<1x8x4xf32> to vector<8x4xf32>
    %c2 = arith.constant 2 : index
    %c0_10 = arith.constant 0 : index
    %c0_11 = arith.constant 0 : index
    %13 = vector.load %arg3[%c2, %c0_10, %c0_11] : memref<4x8x4xf32, #tpu.memory_space<vmem>>, vector<1x8x4xf32>
    %14 = vector.shape_cast %13 : vector<1x8x4xf32> to vector<8x4xf32>
    %c3 = arith.constant 3 : index
    %c0_12 = arith.constant 0 : index
    %c0_13 = arith.constant 0 : index
    %15 = vector.load %arg3[%c3, %c0_12, %c0_13] : memref<4x8x4xf32, #tpu.memory_space<vmem>>, vector<1x8x4xf32>
    %16 = vector.shape_cast %15 : vector<1x8x4xf32> to vector<8x4xf32>
    %c0_14 = arith.constant 0 : index
    %c0_15 = arith.constant 0 : index
    %c0_16 = arith.constant 0 : index
    %17 = vector.load %arg4[%c0_14, %c0_15, %c0_16] : memref<2x16x8xf32, #tpu.memory_space<vmem>>, vector<1x16x8xf32>
    %18 = vector.shape_cast %17 : vector<1x16x8xf32> to vector<16x8xf32>
    %c1_17 = arith.constant 1 : index
    %c0_18 = arith.constant 0 : index
    %c0_19 = arith.constant 0 : index
    %19 = vector.load %arg4[%c1_17, %c0_18, %c0_19] : memref<2x16x8xf32, #tpu.memory_space<vmem>>, vector<1x16x8xf32>
    %20 = vector.shape_cast %19 : vector<1x16x8xf32> to vector<16x8xf32>
    %c0_20 = arith.constant 0 : index
    %c0_21 = arith.constant 0 : index
    %c0_22 = arith.constant 0 : index
    %c0_23 = arith.constant 0 : index
    %21 = vector.load %arg2[%c0_20, %c0_21, %c0_22, %c0_23] : memref<1x4x8x32xf32, #tpu.memory_space<vmem>>, vector<1x4x1x16xf32>
    %22 = vector.shape_cast %21 : vector<1x4x1x16xf32> to vector<4x16xf32>
    %23 = arith.mulf %22, %2 : vector<4x16xf32>
    %24 = arith.addf %23, %5 : vector<4x16xf32>
    %cst = arith.constant 0.00999999977 : f32
    %25 = vector.broadcast %cst : f32 to vector<4x16xf32>
    %26 = arith.mulf %25, %24 : vector<4x16xf32>
    %27 = arith.maximumf %24, %26 : vector<4x16xf32>
    %cst_24 = arith.constant dense<0.000000e+00> : vector<4x8xf32>
    %28 = tpu.matmul %27, %18, %cst_24 {dimension_numbers = #tpu.dot_dimension_numbers<[1], [0], [0], [1], [0, 0, 1, 1], [], []>} : vector<4x16xf32>, vector<16x8xf32>, vector<4x8xf32> -> vector<4x8xf32>
    %cst_25 = arith.constant dense<0.000000e+00> : vector<8x8xf32>
    %29 = tpu.matmul %10, %28, %cst_25 {dimension_numbers = #tpu.dot_dimension_numbers<[1], [0], [0], [1], [0, 0, 1, 1], [], []>} : vector<8x4xf32>, vector<4x8xf32>, vector<8x8xf32> -> vector<8x8xf32>
    %30 = arith.addf %8, %29 : vector<8x8xf32>
    %cst_26 = arith.constant dense<0.000000e+00> : vector<4x8xf32>
    %31 = tpu.matmul %27, %20, %cst_26 {dimension_numbers = #tpu.dot_dimension_numbers<[1], [0], [0], [1], [0, 0, 1, 1], [], []>} : vector<4x16xf32>, vector<16x8xf32>, vector<4x8xf32> -> vector<4x8xf32>
    %cst_27 = arith.constant dense<0.000000e+00> : vector<8x8xf32>
    %32 = tpu.matmul %12, %31, %cst_27 {dimension_numbers = #tpu.dot_dimension_numbers<[1], [0], [0], [1], [0, 0, 1, 1], [], []>} : vector<8x4xf32>, vector<4x8xf32>, vector<8x8xf32> -> vector<8x8xf32>
    %33 = arith.addf %30, %32 : vector<8x8xf32>
    %c0_28 = arith.constant 0 : index
    %c0_29 = arith.constant 0 : index
    %c0_30 = arith.constant 0 : index
    %c16 = arith.constant 16 : index
    %34 = vector.load %arg2[%c0_28, %c0_29, %c0_30, %c16] : memref<1x4x8x32xf32, #tpu.memory_space<vmem>>, vector<1x4x1x16xf32>
    %35 = vector.shape_cast %34 : vector<1x4x1x16xf32> to vector<4x16xf32>
    %36 = arith.mulf %35, %2 : vector<4x16xf32>
    %37 = arith.addf %36, %5 : vector<4x16xf32>
    %cst_31 = arith.constant 0.00999999977 : f32
    %38 = vector.broadcast %cst_31 : f32 to vector<4x16xf32>
    %39 = arith.mulf %38, %37 : vector<4x16xf32>
    %40 = arith.maximumf %37, %39 : vector<4x16xf32>
    %cst_32 = arith.constant dense<0.000000e+00> : vector<4x8xf32>
    %41 = tpu.matmul %40, %18, %cst_32 {dimension_numbers = #tpu.dot_dimension_numbers<[1], [0], [0], [1], [0, 0, 1, 1], [], []>} : vector<4x16xf32>, vector<16x8xf32>, vector<4x8xf32> -> vector<4x8xf32>
    %cst_33 = arith.constant dense<0.000000e+00> : vector<8x8xf32>
    %42 = tpu.matmul %14, %41, %cst_33 {dimension_numbers = #tpu.dot_dimension_numbers<[1], [0], [0], [1], [0, 0, 1, 1], [], []>} : vector<8x4xf32>, vector<4x8xf32>, vector<8x8xf32> -> vector<8x8xf32>
    %43 = arith.addf %33, %42 : vector<8x8xf32>
    %cst_34 = arith.constant dense<0.000000e+00> : vector<4x8xf32>
    %44 = tpu.matmul %40, %20, %cst_34 {dimension_numbers = #tpu.dot_dimension_numbers<[1], [0], [0], [1], [0, 0, 1, 1], [], []>} : vector<4x16xf32>, vector<16x8xf32>, vector<4x8xf32> -> vector<4x8xf32>
    %cst_35 = arith.constant dense<0.000000e+00> : vector<8x8xf32>
    %45 = tpu.matmul %16, %44, %cst_35 {dimension_numbers = #tpu.dot_dimension_numbers<[1], [0], [0], [1], [0, 0, 1, 1], [], []>} : vector<8x4xf32>, vector<4x8xf32>, vector<8x8xf32> -> vector<8x8xf32>
    %46 = arith.addf %43, %45 : vector<8x8xf32>
    %c0_36 = arith.constant 0 : index
    %c0_37 = arith.constant 0 : index
    %c0_38 = arith.constant 0 : index
    %c0_39 = arith.constant 0 : index
    %47 = vector.load %arg8[%c0_36, %c0_37, %c0_38, %c0_39] : memref<1x8x8x8xf32, #tpu.memory_space<vmem>>, vector<1x8x1x8xf32>
    %48 = vector.shape_cast %47 : vector<1x8x1x8xf32> to vector<8x8xf32>
    %49 = vector.shape_cast %46 : vector<8x8xf32> to vector<1x8x1x8xf32>
    tpu.vector_store %arg8[%c0_36, %c0_37, %c0_38, %c0_39], %49 {strides = array<i32>} : memref<1x8x8x8xf32, #tpu.memory_space<vmem>>, vector<1x8x1x8xf32>,
    %c0_40 = arith.constant 0 : index
    %c0_41 = arith.constant 0 : index
    %c1_42 = arith.constant 1 : index
    %c0_43 = arith.constant 0 : index
    %50 = vector.load %arg2[%c0_40, %c0_41, %c1_42, %c0_43] : memref<1x4x8x32xf32, #tpu.memory_space<vmem>>, vector<1x4x1x16xf32>
    %51 = vector.shape_cast %50 : vector<1x4x1x16xf32> to vector<4x16xf32>
    %52 = arith.mulf %51, %2 : vector<4x16xf32>
    %53 = arith.addf %52, %5 : vector<4x16xf32>
    %cst_44 = arith.constant 0.00999999977 : f32
    %54 = vector.broadcast %cst_44 : f32 to vector<4x16xf32>
    %55 = arith.mulf %54, %53 : vector<4x16xf32>
    %56 = arith.maximumf %53, %55 : vector<4x16xf32>
    %cst_45 = arith.constant dense<0.000000e+00> : vector<4x8xf32>
    %57 = tpu.matmul %56, %18, %cst_45 {dimension_numbers = #tpu.dot_dimension_numbers<[1], [0], [0], [1], [0, 0, 1, 1], [], []>} : vector<4x16xf32>, vector<16x8xf32>, vector<4x8xf32> -> vector<4x8xf32>
    %cst_46 = arith.constant dense<0.000000e+00> : vector<8x8xf32>
    %58 = tpu.matmul %10, %57, %cst_46 {dimension_numbers = #tpu.dot_dimension_numbers<[1], [0], [0], [1], [0, 0, 1, 1], [], []>} : vector<8x4xf32>, vector<4x8xf32>, vector<8x8xf32> -> vector<8x8xf32>
    %59 = arith.addf %8, %58 : vector<8x8xf32>
    %cst_47 = arith.constant dense<0.000000e+00> : vector<4x8xf32>
    %60 = tpu.matmul %56, %20, %cst_47 {dimension_numbers = #tpu.dot_dimension_numbers<[1], [0], [0], [1], [0, 0, 1, 1], [], []>} : vector<4x16xf32>, vector<16x8xf32>, vector<4x8xf32> -> vector<4x8xf32>
    %cst_48 = arith.constant dense<0.000000e+00> : vector<8x8xf32>
    %61 = tpu.matmul %12, %60, %cst_48 {dimension_numbers = #tpu.dot_dimension_numbers<[1], [0], [0], [1], [0, 0, 1, 1], [], []>} : vector<8x4xf32>, vector<4x8xf32>, vector<8x8xf32> -> vector<8x8xf32>
    %62 = arith.addf %59, %61 : vector<8x8xf32>
    %c0_49 = arith.constant 0 : index
    %c0_50 = arith.constant 0 : index
    %c1_51 = arith.constant 1 : index
    %c16_52 = arith.constant 16 : index
    %63 = vector.load %arg2[%c0_49, %c0_50, %c1_51, %c16_52] : memref<1x4x8x32xf32, #tpu.memory_space<vmem>>, vector<1x4x1x16xf32>
    %64 = vector.shape_cast %63 : vector<1x4x1x16xf32> to vector<4x16xf32>
    %65 = arith.mulf %64, %2 : vector<4x16xf32>
    %66 = arith.addf %65, %5 : vector<4x16xf32>
    %cst_53 = arith.constant 0.00999999977 : f32
    %67 = vector.broadcast %cst_53 : f32 to vector<4x16xf32>
    %68 = arith.mulf %67, %66 : vector<4x16xf32>
    %69 = arith.maximumf %66, %68 : vector<4x16xf32>
    %cst_54 = arith.constant dense<0.000000e+00> : vector<4x8xf32>
    %70 = tpu.matmul %69, %18, %cst_54 {dimension_numbers = #tpu.dot_dimension_numbers<[1], [0], [0], [1], [0, 0, 1, 1], [], []>} : vector<4x16xf32>, vector<16x8xf32>, vector<4x8xf32> -> vector<4x8xf32>
    %cst_55 = arith.constant dense<0.000000e+00> : vector<8x8xf32>
    %71 = tpu.matmul %14, %70, %cst_55 {dimension_numbers = #tpu.dot_dimension_numbers<[1], [0], [0], [1], [0, 0, 1, 1], [], []>} : vector<8x4xf32>, vector<4x8xf32>, vector<8x8xf32> -> vector<8x8xf32>
    %72 = arith.addf %62, %71 : vector<8x8xf32>
    %cst_56 = arith.constant dense<0.000000e+00> : vector<4x8xf32>
    %73 = tpu.matmul %69, %20, %cst_56 {dimension_numbers = #tpu.dot_dimension_numbers<[1], [0], [0], [1], [0, 0, 1, 1], [], []>} : vector<4x16xf32>, vector<16x8xf32>, vector<4x8xf32> -> vector<4x8xf32>
    %cst_57 = arith.constant dense<0.000000e+00> : vector<8x8xf32>
    %74 = tpu.matmul %16, %73, %cst_57 {dimension_numbers = #tpu.dot_dimension_numbers<[1], [0], [0], [1], [0, 0, 1, 1], [], []>} : vector<8x4xf32>, vector<4x8xf32>, vector<8x8xf32> -> vector<8x8xf32>
    %75 = arith.addf %72, %74 : vector<8x8xf32>
    %c0_58 = arith.constant 0 : index
    %c0_59 = arith.constant 0 : index
    %c1_60 = arith.constant 1 : index
    %c0_61 = arith.constant 0 : index
    %76 = vector.load %arg8[%c0_58, %c0_59, %c1_60, %c0_61] : memref<1x8x8x8xf32, #tpu.memory_space<vmem>>, vector<1x8x1x8xf32>
    %77 = vector.shape_cast %76 : vector<1x8x1x8xf32> to vector<8x8xf32>
    %78 = vector.shape_cast %75 : vector<8x8xf32> to vector<1x8x1x8xf32>
    tpu.vector_store %arg8[%c0_58, %c0_59, %c1_60, %c0_61], %78 {strides = array<i32>} : memref<1x8x8x8xf32, #tpu.memory_space<vmem>>, vector<1x8x1x8xf32>,
    %c0_62 = arith.constant 0 : index
    %c0_63 = arith.constant 0 : index
    %c2_64 = arith.constant 2 : index
    %c0_65 = arith.constant 0 : index
    %79 = vector.load %arg2[%c0_62, %c0_63, %c2_64, %c0_65] : memref<1x4x8x32xf32, #tpu.memory_space<vmem>>, vector<1x4x1x16xf32>
    %80 = vector.shape_cast %79 : vector<1x4x1x16xf32> to vector<4x16xf32>
    %81 = arith.mulf %80, %2 : vector<4x16xf32>
    %82 = arith.addf %81, %5 : vector<4x16xf32>
    %cst_66 = arith.constant 0.00999999977 : f32
    %83 = vector.broadcast %cst_66 : f32 to vector<4x16xf32>
    %84 = arith.mulf %83, %82 : vector<4x16xf32>
    %85 = arith.maximumf %82, %84 : vector<4x16xf32>
    %cst_67 = arith.constant dense<0.000000e+00> : vector<4x8xf32>
    %86 = tpu.matmul %85, %18, %cst_67 {dimension_numbers = #tpu.dot_dimension_numbers<[1], [0], [0], [1], [0, 0, 1, 1], [], []>} : vector<4x16xf32>, vector<16x8xf32>, vector<4x8xf32> -> vector<4x8xf32>
    %cst_68 = arith.constant dense<0.000000e+00> : vector<8x8xf32>
    %87 = tpu.matmul %10, %86, %cst_68 {dimension_numbers = #tpu.dot_dimension_numbers<[1], [0], [0], [1], [0, 0, 1, 1], [], []>} : vector<8x4xf32>, vector<4x8xf32>, vector<8x8xf32> -> vector<8x8xf32>
    %88 = arith.addf %8, %87 : vector<8x8xf32>
    %cst_69 = arith.constant dense<0.000000e+00> : vector<4x8xf32>
    %89 = tpu.matmul %85, %20, %cst_69 {dimension_numbers = #tpu.dot_dimension_numbers<[1], [0], [0], [1], [0, 0, 1, 1], [], []>} : vector<4x16xf32>, vector<16x8xf32>, vector<4x8xf32> -> vector<4x8xf32>
    %cst_70 = arith.constant dense<0.000000e+00> : vector<8x8xf32>
    %90 = tpu.matmul %12, %89, %cst_70 {dimension_numbers = #tpu.dot_dimension_numbers<[1], [0], [0], [1], [0, 0, 1, 1], [], []>} : vector<8x4xf32>, vector<4x8xf32>, vector<8x8xf32> -> vector<8x8xf32>
    %91 = arith.addf %88, %90 : vector<8x8xf32>
    %c0_71 = arith.constant 0 : index
    %c0_72 = arith.constant 0 : index
    %c2_73 = arith.constant 2 : index
    %c16_74 = arith.constant 16 : index
    %92 = vector.load %arg2[%c0_71, %c0_72, %c2_73, %c16_74] : memref<1x4x8x32xf32, #tpu.memory_space<vmem>>, vector<1x4x1x16xf32>
    %93 = vector.shape_cast %92 : vector<1x4x1x16xf32> to vector<4x16xf32>
    %94 = arith.mulf %93, %2 : vector<4x16xf32>
    %95 = arith.addf %94, %5 : vector<4x16xf32>
    %cst_75 = arith.constant 0.00999999977 : f32
    %96 = vector.broadcast %cst_75 : f32 to vector<4x16xf32>
    %97 = arith.mulf %96, %95 : vector<4x16xf32>
    %98 = arith.maximumf %95, %97 : vector<4x16xf32>
    %cst_76 = arith.constant dense<0.000000e+00> : vector<4x8xf32>
    %99 = tpu.matmul %98, %18, %cst_76 {dimension_numbers = #tpu.dot_dimension_numbers<[1], [0], [0], [1], [0, 0, 1, 1], [], []>} : vector<4x16xf32>, vector<16x8xf32>, vector<4x8xf32> -> vector<4x8xf32>
    %cst_77 = arith.constant dense<0.000000e+00> : vector<8x8xf32>
    %100 = tpu.matmul %14, %99, %cst_77 {dimension_numbers = #tpu.dot_dimension_numbers<[1], [0], [0], [1], [0, 0, 1, 1], [], []>} : vector<8x4xf32>, vector<4x8xf32>, vector<8x8xf32> -> vector<8x8xf32>
    %101 = arith.addf %91, %100 : vector<8x8xf32>
    %cst_78 = arith.constant dense<0.000000e+00> : vector<4x8xf32>
    %102 = tpu.matmul %98, %20, %cst_78 {dimension_numbers = #tpu.dot_dimension_numbers<[1], [0], [0], [1], [0, 0, 1, 1], [], []>} : vector<4x16xf32>, vector<16x8xf32>, vector<4x8xf32> -> vector<4x8xf32>
    %cst_79 = arith.constant dense<0.000000e+00> : vector<8x8xf32>
    %103 = tpu.matmul %16, %102, %cst_79 {dimension_numbers = #tpu.dot_dimension_numbers<[1], [0], [0], [1], [0, 0, 1, 1], [], []>} : vector<8x4xf32>, vector<4x8xf32>, vector<8x8xf32> -> vector<8x8xf32>
    %104 = arith.addf %101, %103 : vector<8x8xf32>
    %c0_80 = arith.constant 0 : index
    %c0_81 = arith.constant 0 : index
    %c2_82 = arith.constant 2 : index
    %c0_83 = arith.constant 0 : index
    %105 = vector.load %arg8[%c0_80, %c0_81, %c2_82, %c0_83] : memref<1x8x8x8xf32, #tpu.memory_space<vmem>>, vector<1x8x1x8xf32>
    %106 = vector.shape_cast %105 : vector<1x8x1x8xf32> to vector<8x8xf32>
    %107 = vector.shape_cast %104 : vector<8x8xf32> to vector<1x8x1x8xf32>
    tpu.vector_store %arg8[%c0_80, %c0_81, %c2_82, %c0_83], %107 {strides = array<i32>} : memref<1x8x8x8xf32, #tpu.memory_space<vmem>>, vector<1x8x1x8xf32>,
    %c0_84 = arith.constant 0 : index
    %c0_85 = arith.constant 0 : index
    %c3_86 = arith.constant 3 : index
    %c0_87 = arith.constant 0 : index
    %108 = vector.load %arg2[%c0_84, %c0_85, %c3_86, %c0_87] : memref<1x4x8x32xf32, #tpu.memory_space<vmem>>, vector<1x4x1x16xf32>
    %109 = vector.shape_cast %108 : vector<1x4x1x16xf32> to vector<4x16xf32>
    %110 = arith.mulf %109, %2 : vector<4x16xf32>
    %111 = arith.addf %110, %5 : vector<4x16xf32>
    %cst_88 = arith.constant 0.00999999977 : f32
    %112 = vector.broadcast %cst_88 : f32 to vector<4x16xf32>
    %113 = arith.mulf %112, %111 : vector<4x16xf32>
    %114 = arith.maximumf %111, %113 : vector<4x16xf32>
    %cst_89 = arith.constant dense<0.000000e+00> : vector<4x8xf32>
    %115 = tpu.matmul %114, %18, %cst_89 {dimension_numbers = #tpu.dot_dimension_numbers<[1], [0], [0], [1], [0, 0, 1, 1], [], []>} : vector<4x16xf32>, vector<16x8xf32>, vector<4x8xf32> -> vector<4x8xf32>
    %cst_90 = arith.constant dense<0.000000e+00> : vector<8x8xf32>
    %116 = tpu.matmul %10, %115, %cst_90 {dimension_numbers = #tpu.dot_dimension_numbers<[1], [0], [0], [1], [0, 0, 1, 1], [], []>} : vector<8x4xf32>, vector<4x8xf32>, vector<8x8xf32> -> vector<8x8xf32>
    %117 = arith.addf %8, %116 : vector<8x8xf32>
    %cst_91 = arith.constant dense<0.000000e+00> : vector<4x8xf32>
    %118 = tpu.matmul %114, %20, %cst_91 {dimension_numbers = #tpu.dot_dimension_numbers<[1], [0], [0], [1], [0, 0, 1, 1], [], []>} : vector<4x16xf32>, vector<16x8xf32>, vector<4x8xf32> -> vector<4x8xf32>
    %cst_92 = arith.constant dense<0.000000e+00> : vector<8x8xf32>
    %119 = tpu.matmul %12, %118, %cst_92 {dimension_numbers = #tpu.dot_dimension_numbers<[1], [0], [0], [1], [0, 0, 1, 1], [], []>} : vector<8x4xf32>, vector<4x8xf32>, vector<8x8xf32> -> vector<8x8xf32>
    %120 = arith.addf %117, %119 : vector<8x8xf32>
    %c0_93 = arith.constant 0 : index
    %c0_94 = arith.constant 0 : index
    %c3_95 = arith.constant 3 : index
    %c16_96 = arith.constant 16 : index
    %121 = vector.load %arg2[%c0_93, %c0_94, %c3_95, %c16_96] : memref<1x4x8x32xf32, #tpu.memory_space<vmem>>, vector<1x4x1x16xf32>
    %122 = vector.shape_cast %121 : vector<1x4x1x16xf32> to vector<4x16xf32>
    %123 = arith.mulf %122, %2 : vector<4x16xf32>
    %124 = arith.addf %123, %5 : vector<4x16xf32>
    %cst_97 = arith.constant 0.00999999977 : f32
    %125 = vector.broadcast %cst_97 : f32 to vector<4x16xf32>
    %126 = arith.mulf %125, %124 : vector<4x16xf32>
    %127 = arith.maximumf %124, %126 : vector<4x16xf32>
    %cst_98 = arith.constant dense<0.000000e+00> : vector<4x8xf32>
    %128 = tpu.matmul %127, %18, %cst_98 {dimension_numbers = #tpu.dot_dimension_numbers<[1], [0], [0], [1], [0, 0, 1, 1], [], []>} : vector<4x16xf32>, vector<16x8xf32>, vector<4x8xf32> -> vector<4x8xf32>
    %cst_99 = arith.constant dense<0.000000e+00> : vector<8x8xf32>
    %129 = tpu.matmul %14, %128, %cst_99 {dimension_numbers = #tpu.dot_dimension_numbers<[1], [0], [0], [1], [0, 0, 1, 1], [], []>} : vector<8x4xf32>, vector<4x8xf32>, vector<8x8xf32> -> vector<8x8xf32>
    %130 = arith.addf %120, %129 : vector<8x8xf32>
    %cst_100 = arith.constant dense<0.000000e+00> : vector<4x8xf32>
    %131 = tpu.matmul %127, %20, %cst_100 {dimension_numbers = #tpu.dot_dimension_numbers<[1], [0], [0], [1], [0, 0, 1, 1], [], []>} : vector<4x16xf32>, vector<16x8xf32>, vector<4x8xf32> -> vector<4x8xf32>
    %cst_101 = arith.constant dense<0.000000e+00> : vector<8x8xf32>
    %132 = tpu.matmul %16, %131, %cst_101 {dimension_numbers = #tpu.dot_dimension_numbers<[1], [0], [0], [1], [0, 0, 1, 1], [], []>} : vector<8x4xf32>, vector<4x8xf32>, vector<8x8xf32> -> vector<8x8xf32>
    %133 = arith.addf %130, %132 : vector<8x8xf32>
    %c0_102 = arith.constant 0 : index
    %c0_103 = arith.constant 0 : index
    %c3_104 = arith.constant 3 : index
    %c0_105 = arith.constant 0 : index
    %134 = vector.load %arg8[%c0_102, %c0_103, %c3_104, %c0_105] : memref<1x8x8x8xf32, #tpu.memory_space<vmem>>, vector<1x8x1x8xf32>
    %135 = vector.shape_cast %134 : vector<1x8x1x8xf32> to vector<8x8xf32>
    %136 = vector.shape_cast %133 : vector<8x8xf32> to vector<1x8x1x8xf32>
    tpu.vector_store %arg8[%c0_102, %c0_103, %c3_104, %c0_105], %136 {strides = array<i32>} : memref<1x8x8x8xf32, #tpu.memory_space<vmem>>, vector<1x8x1x8xf32>,
    %c0_106 = arith.constant 0 : index
    %c0_107 = arith.constant 0 : index
    %c4 = arith.constant 4 : index
    %c0_108 = arith.constant 0 : index
    %137 = vector.load %arg2[%c0_106, %c0_107, %c4, %c0_108] : memref<1x4x8x32xf32, #tpu.memory_space<vmem>>, vector<1x4x1x16xf32>
    %138 = vector.shape_cast %137 : vector<1x4x1x16xf32> to vector<4x16xf32>
    %139 = arith.mulf %138, %2 : vector<4x16xf32>
    %140 = arith.addf %139, %5 : vector<4x16xf32>
    %cst_109 = arith.constant 0.00999999977 : f32
    %141 = vector.broadcast %cst_109 : f32 to vector<4x16xf32>
    %142 = arith.mulf %141, %140 : vector<4x16xf32>
    %143 = arith.maximumf %140, %142 : vector<4x16xf32>
    %cst_110 = arith.constant dense<0.000000e+00> : vector<4x8xf32>
    %144 = tpu.matmul %143, %18, %cst_110 {dimension_numbers = #tpu.dot_dimension_numbers<[1], [0], [0], [1], [0, 0, 1, 1], [], []>} : vector<4x16xf32>, vector<16x8xf32>, vector<4x8xf32> -> vector<4x8xf32>
    %cst_111 = arith.constant dense<0.000000e+00> : vector<8x8xf32>
    %145 = tpu.matmul %10, %144, %cst_111 {dimension_numbers = #tpu.dot_dimension_numbers<[1], [0], [0], [1], [0, 0, 1, 1], [], []>} : vector<8x4xf32>, vector<4x8xf32>, vector<8x8xf32> -> vector<8x8xf32>
    %146 = arith.addf %8, %145 : vector<8x8xf32>
    %cst_112 = arith.constant dense<0.000000e+00> : vector<4x8xf32>
    %147 = tpu.matmul %143, %20, %cst_112 {dimension_numbers = #tpu.dot_dimension_numbers<[1], [0], [0], [1], [0, 0, 1, 1], [], []>} : vector<4x16xf32>, vector<16x8xf32>, vector<4x8xf32> -> vector<4x8xf32>
    %cst_113 = arith.constant dense<0.000000e+00> : vector<8x8xf32>
    %148 = tpu.matmul %12, %147, %cst_113 {dimension_numbers = #tpu.dot_dimension_numbers<[1], [0], [0], [1], [0, 0, 1, 1], [], []>} : vector<8x4xf32>, vector<4x8xf32>, vector<8x8xf32> -> vector<8x8xf32>
    %149 = arith.addf %146, %148 : vector<8x8xf32>
    %c0_114 = arith.constant 0 : index
    %c0_115 = arith.constant 0 : index
    %c4_116 = arith.constant 4 : index
    %c16_117 = arith.constant 16 : index
    %150 = vector.load %arg2[%c0_114, %c0_115, %c4_116, %c16_117] : memref<1x4x8x32xf32, #tpu.memory_space<vmem>>, vector<1x4x1x16xf32>
    %151 = vector.shape_cast %150 : vector<1x4x1x16xf32> to vector<4x16xf32>
    %152 = arith.mulf %151, %2 : vector<4x16xf32>
    %153 = arith.addf %152, %5 : vector<4x16xf32>
    %cst_118 = arith.constant 0.00999999977 : f32
    %154 = vector.broadcast %cst_118 : f32 to vector<4x16xf32>
    %155 = arith.mulf %154, %153 : vector<4x16xf32>
    %156 = arith.maximumf %153, %155 : vector<4x16xf32>
    %cst_119 = arith.constant dense<0.000000e+00> : vector<4x8xf32>
    %157 = tpu.matmul %156, %18, %cst_119 {dimension_numbers = #tpu.dot_dimension_numbers<[1], [0], [0], [1], [0, 0, 1, 1], [], []>} : vector<4x16xf32>, vector<16x8xf32>, vector<4x8xf32> -> vector<4x8xf32>
    %cst_120 = arith.constant dense<0.000000e+00> : vector<8x8xf32>
    %158 = tpu.matmul %14, %157, %cst_120 {dimension_numbers = #tpu.dot_dimension_numbers<[1], [0], [0], [1], [0, 0, 1, 1], [], []>} : vector<8x4xf32>, vector<4x8xf32>, vector<8x8xf32> -> vector<8x8xf32>
    %159 = arith.addf %149, %158 : vector<8x8xf32>
    %cst_121 = arith.constant dense<0.000000e+00> : vector<4x8xf32>
    %160 = tpu.matmul %156, %20, %cst_121 {dimension_numbers = #tpu.dot_dimension_numbers<[1], [0], [0], [1], [0, 0, 1, 1], [], []>} : vector<4x16xf32>, vector<16x8xf32>, vector<4x8xf32> -> vector<4x8xf32>
    %cst_122 = arith.constant dense<0.000000e+00> : vector<8x8xf32>
    %161 = tpu.matmul %16, %160, %cst_122 {dimension_numbers = #tpu.dot_dimension_numbers<[1], [0], [0], [1], [0, 0, 1, 1], [], []>} : vector<8x4xf32>, vector<4x8xf32>, vector<8x8xf32> -> vector<8x8xf32>
    %162 = arith.addf %159, %161 : vector<8x8xf32>
    %c0_123 = arith.constant 0 : index
    %c0_124 = arith.constant 0 : index
    %c4_125 = arith.constant 4 : index
    %c0_126 = arith.constant 0 : index
    %163 = vector.load %arg8[%c0_123, %c0_124, %c4_125, %c0_126] : memref<1x8x8x8xf32, #tpu.memory_space<vmem>>, vector<1x8x1x8xf32>
    %164 = vector.shape_cast %163 : vector<1x8x1x8xf32> to vector<8x8xf32>
    %165 = vector.shape_cast %162 : vector<8x8xf32> to vector<1x8x1x8xf32>
    tpu.vector_store %arg8[%c0_123, %c0_124, %c4_125, %c0_126], %165 {strides = array<i32>} : memref<1x8x8x8xf32, #tpu.memory_space<vmem>>, vector<1x8x1x8xf32>,
    %c0_127 = arith.constant 0 : index
    %c0_128 = arith.constant 0 : index
    %c5 = arith.constant 5 : index
    %c0_129 = arith.constant 0 : index
    %166 = vector.load %arg2[%c0_127, %c0_128, %c5, %c0_129] : memref<1x4x8x32xf32, #tpu.memory_space<vmem>>, vector<1x4x1x16xf32>
    %167 = vector.shape_cast %166 : vector<1x4x1x16xf32> to vector<4x16xf32>
    %168 = arith.mulf %167, %2 : vector<4x16xf32>
    %169 = arith.addf %168, %5 : vector<4x16xf32>
    %cst_130 = arith.constant 0.00999999977 : f32
    %170 = vector.broadcast %cst_130 : f32 to vector<4x16xf32>
    %171 = arith.mulf %170, %169 : vector<4x16xf32>
    %172 = arith.maximumf %169, %171 : vector<4x16xf32>
    %cst_131 = arith.constant dense<0.000000e+00> : vector<4x8xf32>
    %173 = tpu.matmul %172, %18, %cst_131 {dimension_numbers = #tpu.dot_dimension_numbers<[1], [0], [0], [1], [0, 0, 1, 1], [], []>} : vector<4x16xf32>, vector<16x8xf32>, vector<4x8xf32> -> vector<4x8xf32>
    %cst_132 = arith.constant dense<0.000000e+00> : vector<8x8xf32>
    %174 = tpu.matmul %10, %173, %cst_132 {dimension_numbers = #tpu.dot_dimension_numbers<[1], [0], [0], [1], [0, 0, 1, 1], [], []>} : vector<8x4xf32>, vector<4x8xf32>, vector<8x8xf32> -> vector<8x8xf32>
    %175 = arith.addf %8, %174 : vector<8x8xf32>
    %cst_133 = arith.constant dense<0.000000e+00> : vector<4x8xf32>
    %176 = tpu.matmul %172, %20, %cst_133 {dimension_numbers = #tpu.dot_dimension_numbers<[1], [0], [0], [1], [0, 0, 1, 1], [], []>} : vector<4x16xf32>, vector<16x8xf32>, vector<4x8xf32> -> vector<4x8xf32>
    %cst_134 = arith.constant dense<0.000000e+00> : vector<8x8xf32>
    %177 = tpu.matmul %12, %176, %cst_134 {dimension_numbers = #tpu.dot_dimension_numbers<[1], [0], [0], [1], [0, 0, 1, 1], [], []>} : vector<8x4xf32>, vector<4x8xf32>, vector<8x8xf32> -> vector<8x8xf32>
    %178 = arith.addf %175, %177 : vector<8x8xf32>
    %c0_135 = arith.constant 0 : index
    %c0_136 = arith.constant 0 : index
    %c5_137 = arith.constant 5 : index
    %c16_138 = arith.constant 16 : index
    %179 = vector.load %arg2[%c0_135, %c0_136, %c5_137, %c16_138] : memref<1x4x8x32xf32, #tpu.memory_space<vmem>>, vector<1x4x1x16xf32>
    %180 = vector.shape_cast %179 : vector<1x4x1x16xf32> to vector<4x16xf32>
    %181 = arith.mulf %180, %2 : vector<4x16xf32>
    %182 = arith.addf %181, %5 : vector<4x16xf32>
    %cst_139 = arith.constant 0.00999999977 : f32
    %183 = vector.broadcast %cst_139 : f32 to vector<4x16xf32>
    %184 = arith.mulf %183, %182 : vector<4x16xf32>
    %185 = arith.maximumf %182, %184 : vector<4x16xf32>
    %cst_140 = arith.constant dense<0.000000e+00> : vector<4x8xf32>
    %186 = tpu.matmul %185, %18, %cst_140 {dimension_numbers = #tpu.dot_dimension_numbers<[1], [0], [0], [1], [0, 0, 1, 1], [], []>} : vector<4x16xf32>, vector<16x8xf32>, vector<4x8xf32> -> vector<4x8xf32>
    %cst_141 = arith.constant dense<0.000000e+00> : vector<8x8xf32>
    %187 = tpu.matmul %14, %186, %cst_141 {dimension_numbers = #tpu.dot_dimension_numbers<[1], [0], [0], [1], [0, 0, 1, 1], [], []>} : vector<8x4xf32>, vector<4x8xf32>, vector<8x8xf32> -> vector<8x8xf32>
    %188 = arith.addf %178, %187 : vector<8x8xf32>
    %cst_142 = arith.constant dense<0.000000e+00> : vector<4x8xf32>
    %189 = tpu.matmul %185, %20, %cst_142 {dimension_numbers = #tpu.dot_dimension_numbers<[1], [0], [0], [1], [0, 0, 1, 1], [], []>} : vector<4x16xf32>, vector<16x8xf32>, vector<4x8xf32> -> vector<4x8xf32>
    %cst_143 = arith.constant dense<0.000000e+00> : vector<8x8xf32>
    %190 = tpu.matmul %16, %189, %cst_143 {dimension_numbers = #tpu.dot_dimension_numbers<[1], [0], [0], [1], [0, 0, 1, 1], [], []>} : vector<8x4xf32>, vector<4x8xf32>, vector<8x8xf32> -> vector<8x8xf32>
    %191 = arith.addf %188, %190 : vector<8x8xf32>
    %c0_144 = arith.constant 0 : index
    %c0_145 = arith.constant 0 : index
    %c5_146 = arith.constant 5 : index
    %c0_147 = arith.constant 0 : index
    %192 = vector.load %arg8[%c0_144, %c0_145, %c5_146, %c0_147] : memref<1x8x8x8xf32, #tpu.memory_space<vmem>>, vector<1x8x1x8xf32>
    %193 = vector.shape_cast %192 : vector<1x8x1x8xf32> to vector<8x8xf32>
    %194 = vector.shape_cast %191 : vector<8x8xf32> to vector<1x8x1x8xf32>
    tpu.vector_store %arg8[%c0_144, %c0_145, %c5_146, %c0_147], %194 {strides = array<i32>} : memref<1x8x8x8xf32, #tpu.memory_space<vmem>>, vector<1x8x1x8xf32>,
    %c0_148 = arith.constant 0 : index
    %c0_149 = arith.constant 0 : index
    %c6 = arith.constant 6 : index
    %c0_150 = arith.constant 0 : index
    %195 = vector.load %arg2[%c0_148, %c0_149, %c6, %c0_150] : memref<1x4x8x32xf32, #tpu.memory_space<vmem>>, vector<1x4x1x16xf32>
    %196 = vector.shape_cast %195 : vector<1x4x1x16xf32> to vector<4x16xf32>
    %197 = arith.mulf %196, %2 : vector<4x16xf32>
    %198 = arith.addf %197, %5 : vector<4x16xf32>
    %cst_151 = arith.constant 0.00999999977 : f32
    %199 = vector.broadcast %cst_151 : f32 to vector<4x16xf32>
    %200 = arith.mulf %199, %198 : vector<4x16xf32>
    %201 = arith.maximumf %198, %200 : vector<4x16xf32>
    %cst_152 = arith.constant dense<0.000000e+00> : vector<4x8xf32>
    %202 = tpu.matmul %201, %18, %cst_152 {dimension_numbers = #tpu.dot_dimension_numbers<[1], [0], [0], [1], [0, 0, 1, 1], [], []>} : vector<4x16xf32>, vector<16x8xf32>, vector<4x8xf32> -> vector<4x8xf32>
    %cst_153 = arith.constant dense<0.000000e+00> : vector<8x8xf32>
    %203 = tpu.matmul %10, %202, %cst_153 {dimension_numbers = #tpu.dot_dimension_numbers<[1], [0], [0], [1], [0, 0, 1, 1], [], []>} : vector<8x4xf32>, vector<4x8xf32>, vector<8x8xf32> -> vector<8x8xf32>
    %204 = arith.addf %8, %203 : vector<8x8xf32>
    %cst_154 = arith.constant dense<0.000000e+00> : vector<4x8xf32>
    %205 = tpu.matmul %201, %20, %cst_154 {dimension_numbers = #tpu.dot_dimension_numbers<[1], [0], [0], [1], [0, 0, 1, 1], [], []>} : vector<4x16xf32>, vector<16x8xf32>, vector<4x8xf32> -> vector<4x8xf32>
    %cst_155 = arith.constant dense<0.000000e+00> : vector<8x8xf32>
    %206 = tpu.matmul %12, %205, %cst_155 {dimension_numbers = #tpu.dot_dimension_numbers<[1], [0], [0], [1], [0, 0, 1, 1], [], []>} : vector<8x4xf32>, vector<4x8xf32>, vector<8x8xf32> -> vector<8x8xf32>
    %207 = arith.addf %204, %206 : vector<8x8xf32>
    %c0_156 = arith.constant 0 : index
    %c0_157 = arith.constant 0 : index
    %c6_158 = arith.constant 6 : index
    %c16_159 = arith.constant 16 : index
    %208 = vector.load %arg2[%c0_156, %c0_157, %c6_158, %c16_159] : memref<1x4x8x32xf32, #tpu.memory_space<vmem>>, vector<1x4x1x16xf32>
    %209 = vector.shape_cast %208 : vector<1x4x1x16xf32> to vector<4x16xf32>
    %210 = arith.mulf %209, %2 : vector<4x16xf32>
    %211 = arith.addf %210, %5 : vector<4x16xf32>
    %cst_160 = arith.constant 0.00999999977 : f32
    %212 = vector.broadcast %cst_160 : f32 to vector<4x16xf32>
    %213 = arith.mulf %212, %211 : vector<4x16xf32>
    %214 = arith.maximumf %211, %213 : vector<4x16xf32>
    %cst_161 = arith.constant dense<0.000000e+00> : vector<4x8xf32>
    %215 = tpu.matmul %214, %18, %cst_161 {dimension_numbers = #tpu.dot_dimension_numbers<[1], [0], [0], [1], [0, 0, 1, 1], [], []>} : vector<4x16xf32>, vector<16x8xf32>, vector<4x8xf32> -> vector<4x8xf32>
    %cst_162 = arith.constant dense<0.000000e+00> : vector<8x8xf32>
    %216 = tpu.matmul %14, %215, %cst_162 {dimension_numbers = #tpu.dot_dimension_numbers<[1], [0], [0], [1], [0, 0, 1, 1], [], []>} : vector<8x4xf32>, vector<4x8xf32>, vector<8x8xf32> -> vector<8x8xf32>
    %217 = arith.addf %207, %216 : vector<8x8xf32>
    %cst_163 = arith.constant dense<0.000000e+00> : vector<4x8xf32>
    %218 = tpu.matmul %214, %20, %cst_163 {dimension_numbers = #tpu.dot_dimension_numbers<[1], [0], [0], [1], [0, 0, 1, 1], [], []>} : vector<4x16xf32>, vector<16x8xf32>, vector<4x8xf32> -> vector<4x8xf32>
    %cst_164 = arith.constant dense<0.000000e+00> : vector<8x8xf32>
    %219 = tpu.matmul %16, %218, %cst_164 {dimension_numbers = #tpu.dot_dimension_numbers<[1], [0], [0], [1], [0, 0, 1, 1], [], []>} : vector<8x4xf32>, vector<4x8xf32>, vector<8x8xf32> -> vector<8x8xf32>
    %220 = arith.addf %217, %219 : vector<8x8xf32>
    %c0_165 = arith.constant 0 : index
    %c0_166 = arith.constant 0 : index
    %c6_167 = arith.constant 6 : index
    %c0_168 = arith.constant 0 : index
    %221 = vector.load %arg8[%c0_165, %c0_166, %c6_167, %c0_168] : memref<1x8x8x8xf32, #tpu.memory_space<vmem>>, vector<1x8x1x8xf32>
    %222 = vector.shape_cast %221 : vector<1x8x1x8xf32> to vector<8x8xf32>
    %223 = vector.shape_cast %220 : vector<8x8xf32> to vector<1x8x1x8xf32>
    tpu.vector_store %arg8[%c0_165, %c0_166, %c6_167, %c0_168], %223 {strides = array<i32>} : memref<1x8x8x8xf32, #tpu.memory_space<vmem>>, vector<1x8x1x8xf32>,
    %c0_169 = arith.constant 0 : index
    %c0_170 = arith.constant 0 : index
    %c7 = arith.constant 7 : index
    %c0_171 = arith.constant 0 : index
    %224 = vector.load %arg2[%c0_169, %c0_170, %c7, %c0_171] : memref<1x4x8x32xf32, #tpu.memory_space<vmem>>, vector<1x4x1x16xf32>
    %225 = vector.shape_cast %224 : vector<1x4x1x16xf32> to vector<4x16xf32>
    %226 = arith.mulf %225, %2 : vector<4x16xf32>
    %227 = arith.addf %226, %5 : vector<4x16xf32>
    %cst_172 = arith.constant 0.00999999977 : f32
    %228 = vector.broadcast %cst_172 : f32 to vector<4x16xf32>
    %229 = arith.mulf %228, %227 : vector<4x16xf32>
    %230 = arith.maximumf %227, %229 : vector<4x16xf32>
    %cst_173 = arith.constant dense<0.000000e+00> : vector<4x8xf32>
    %231 = tpu.matmul %230, %18, %cst_173 {dimension_numbers = #tpu.dot_dimension_numbers<[1], [0], [0], [1], [0, 0, 1, 1], [], []>} : vector<4x16xf32>, vector<16x8xf32>, vector<4x8xf32> -> vector<4x8xf32>
    %cst_174 = arith.constant dense<0.000000e+00> : vector<8x8xf32>
    %232 = tpu.matmul %10, %231, %cst_174 {dimension_numbers = #tpu.dot_dimension_numbers<[1], [0], [0], [1], [0, 0, 1, 1], [], []>} : vector<8x4xf32>, vector<4x8xf32>, vector<8x8xf32> -> vector<8x8xf32>
    %233 = arith.addf %8, %232 : vector<8x8xf32>
    %cst_175 = arith.constant dense<0.000000e+00> : vector<4x8xf32>
    %234 = tpu.matmul %230, %20, %cst_175 {dimension_numbers = #tpu.dot_dimension_numbers<[1], [0], [0], [1], [0, 0, 1, 1], [], []>} : vector<4x16xf32>, vector<16x8xf32>, vector<4x8xf32> -> vector<4x8xf32>
    %cst_176 = arith.constant dense<0.000000e+00> : vector<8x8xf32>
    %235 = tpu.matmul %12, %234, %cst_176 {dimension_numbers = #tpu.dot_dimension_numbers<[1], [0], [0], [1], [0, 0, 1, 1], [], []>} : vector<8x4xf32>, vector<4x8xf32>, vector<8x8xf32> -> vector<8x8xf32>
    %236 = arith.addf %233, %235 : vector<8x8xf32>
    %c0_177 = arith.constant 0 : index
    %c0_178 = arith.constant 0 : index
    %c7_179 = arith.constant 7 : index
    %c16_180 = arith.constant 16 : index
    %237 = vector.load %arg2[%c0_177, %c0_178, %c7_179, %c16_180] : memref<1x4x8x32xf32, #tpu.memory_space<vmem>>, vector<1x4x1x16xf32>
    %238 = vector.shape_cast %237 : vector<1x4x1x16xf32> to vector<4x16xf32>
    %239 = arith.mulf %238, %2 : vector<4x16xf32>
    %240 = arith.addf %239, %5 : vector<4x16xf32>
    %cst_181 = arith.constant 0.00999999977 : f32
    %241 = vector.broadcast %cst_181 : f32 to vector<4x16xf32>
    %242 = arith.mulf %241, %240 : vector<4x16xf32>
    %243 = arith.maximumf %240, %242 : vector<4x16xf32>
    %cst_182 = arith.constant dense<0.000000e+00> : vector<4x8xf32>
    %244 = tpu.matmul %243, %18, %cst_182 {dimension_numbers = #tpu.dot_dimension_numbers<[1], [0], [0], [1], [0, 0, 1, 1], [], []>} : vector<4x16xf32>, vector<16x8xf32>, vector<4x8xf32> -> vector<4x8xf32>
    %cst_183 = arith.constant dense<0.000000e+00> : vector<8x8xf32>
    %245 = tpu.matmul %14, %244, %cst_183 {dimension_numbers = #tpu.dot_dimension_numbers<[1], [0], [0], [1], [0, 0, 1, 1], [], []>} : vector<8x4xf32>, vector<4x8xf32>, vector<8x8xf32> -> vector<8x8xf32>
    %246 = arith.addf %236, %245 : vector<8x8xf32>
    %cst_184 = arith.constant dense<0.000000e+00> : vector<4x8xf32>
    %247 = tpu.matmul %243, %20, %cst_184 {dimension_numbers = #tpu.dot_dimension_numbers<[1], [0], [0], [1], [0, 0, 1, 1], [], []>} : vector<4x16xf32>, vector<16x8xf32>, vector<4x8xf32> -> vector<4x8xf32>
    %cst_185 = arith.constant dense<0.000000e+00> : vector<8x8xf32>
    %248 = tpu.matmul %16, %247, %cst_185 {dimension_numbers = #tpu.dot_dimension_numbers<[1], [0], [0], [1], [0, 0, 1, 1], [], []>} : vector<8x4xf32>, vector<4x8xf32>, vector<8x8xf32> -> vector<8x8xf32>
    %249 = arith.addf %246, %248 : vector<8x8xf32>
    %c0_186 = arith.constant 0 : index
    %c0_187 = arith.constant 0 : index
    %c7_188 = arith.constant 7 : index
    %c0_189 = arith.constant 0 : index
    %250 = vector.load %arg8[%c0_186, %c0_187, %c7_188, %c0_189] : memref<1x8x8x8xf32, #tpu.memory_space<vmem>>, vector<1x8x1x8xf32>
    %251 = vector.shape_cast %250 : vector<1x8x1x8xf32> to vector<8x8xf32>
    %252 = vector.shape_cast %249 : vector<8x8xf32> to vector<1x8x1x8xf32>
    tpu.vector_store %arg8[%c0_186, %c0_187, %c7_188, %c0_189], %252 {strides = array<i32>} : memref<1x8x8x8xf32, #tpu.memory_space<vmem>>, vector<1x8x1x8xf32>,
    return
  }
  func.func @transform_0(%arg0: i32, %arg1: i32) -> (i32, i32, i32, i32) {
    %c0_i32 = arith.constant 0 : i32
    %c0_i32_0 = arith.constant 0 : i32
    %c0_i32_1 = arith.constant 0 : i32
    return %arg0, %c0_i32, %arg1, %c0_i32_0 : i32, i32, i32, i32
  }
  func.func @transform_1(%arg0: i32, %arg1: i32) -> (i32, i32, i32) {
    %c0_i32 = arith.constant 0 : i32
    %c0_i32_0 = arith.constant 0 : i32
    %c0_i32_1 = arith.constant 0 : i32
    %c0_i32_2 = arith.constant 0 : i32
    return %c0_i32, %c0_i32_0, %c0_i32_1 : i32, i32, i32
  }
  func.func @transform_2(%arg0: i32, %arg1: i32) -> (i32, i32, i32) {
    %c0_i32 = arith.constant 0 : i32
    %c0_i32_0 = arith.constant 0 : i32
    %c0_i32_1 = arith.constant 0 : i32
    %c0_i32_2 = arith.constant 0 : i32
    return %c0_i32, %c0_i32_0, %c0_i32_1 : i32, i32, i32
  }
  func.func @transform_3(%arg0: i32, %arg1: i32) -> (i32, i32) {
    %c0_i32 = arith.constant 0 : i32
    %c0_i32_0 = arith.constant 0 : i32
    %c0_i32_1 = arith.constant 0 : i32
    return %c0_i32, %c0_i32_0 : i32, i32
  }
  func.func @transform_4(%arg0: i32, %arg1: i32) -> (i32, i32) {
    %c0_i32 = arith.constant 0 : i32
    %c0_i32_0 = arith.constant 0 : i32
    %c0_i32_1 = arith.constant 0 : i32
    return %c0_i32, %c0_i32_0 : i32, i32
  }
  func.func @transform_5(%arg0: i32, %arg1: i32) -> (i32, i32) {
    %c0_i32 = arith.constant 0 : i32
    %c0_i32_0 = arith.constant 0 : i32
    %c0_i32_1 = arith.constant 0 : i32
    return %c0_i32, %c0_i32_0 : i32, i32
  }
  func.func @transform_6(%arg0: i32, %arg1: i32) -> (i32, i32, i32, i32) {
    %c0_i32 = arith.constant 0 : i32
    %c0_i32_0 = arith.constant 0 : i32
    %c0_i32_1 = arith.constant 0 : i32
    return %arg0, %c0_i32, %arg1, %c0_i32_0 : i32, i32, i32, i32
  }
}

</mosaic_0001>

<bundles_post_ra>
// kernel: downsample_forward.2
= control target key start
LH: loop header
LB: loop body
LE: loop exit
PB: predicated region body
PF: predicated region fallthrough
CT: control target
= control target key end

     0   :  { %s369_s9 = smov 0   ;;  %s371_s10 = smov 0   ;;  %s398_s0 = inlined_call_operand.vmem [shape: f32[2,8,128], index: 0, kind: input, shape index: {}]   ;;  %s399_s1 = inlined_call_operand.vmem [shape: f32[2,8,1], index: 1, kind: output, shape index: {0}]   ;;  %s400_s2 = inlined_call_operand.vmem [shape: f32[2,8,1], index: 2, kind: output, shape index: {1}]  }
   0x1   :  { %s373_s11 = smov 0  }
   0x2 LB: > { %s25_s12 = sadd.s32 1, %s348_s10  ;;  %p300_p0 = scmp.ge.s32.totalorder %s352_s11, 1  ;;  %s352_s11 = sphi %s373_s11, %s13_s11   ;;  %s348_s10 = sphi %s371_s10, %s402_s10   ;;  %s344_s9 = sphi %s369_s9, %s401_s9  }
   0x3   : > { %p27_p1 = scmp.ge.s32.totalorder %s25_s12, 2  ;;  %p135_p2 = scmp.lt.s32.totalorder %s352_s11, 3 }
   0x5   : > { %s404_s12 = smov (%p27_p1, %s25_s12), 0  ;;  %p136_p3 = pnand %p300_p0, %p135_p2 }
   0x6   : > { %p164_p4 = scmp.lt.s32.totalorder (!%p136_p3), %s344_s9, 1  ;;  %vm188_vm0 = vcmask (!%p136_p3), 7168  }
   0x7   : > { %139 = sbr.rel (%p136_p3) target bundleno = 309 (0x135), region = 24 }
   0xe   : > { %s406_s9 = smov (!%p164_p4, %s344_s9), 1 }
   0xf   : > { %s301_s13 = sshll.u32 %s406_s9, 3 }
  0x10   : > { %s170_s16 = scalar_lea.vmem %s398_s0, %s301_s13  ;;  %s175_s19 = scalar_lea.vmem %s399_s1, %s301_s13 }
  0x11   : > { %v183_v0 = vld [vmem:[%s170_s16] sm:$0xff]  ;;  %s181_s22 = scalar_lea.vmem %s400_s2, %s301_s13 }
  0x12   : > { %184 = vadd.xlane.f32.xlu0 %v183_v0 }
  0x9f   : > { %v185_v1 = vpop.xlane.xlu0 %184 }
  0xa0   : > { %v186_v2 = vmul.f32 0.0078125, %v185_v1  ;;  %189 = vst.msk [vmem:[%s175_s19] sm:$0xff] %vm188_vm0, %v185_v1 }
  0xa2   : > { %v187_v3 = vsub.f32 %v183_v0, %v186_v2 }
  0xa4   : > { %v190_v4 = vmul.f32 %v187_v3, %v187_v3 }
  0xa6   : > { %191 = vadd.xlane.f32.xlu0 %v190_v4 }
 0x133   : > { %v192_v5 = vpop.xlane.xlu0 %191 }
 0x134   : > { %193 = vst.msk [vmem:[%s181_s22] sm:$0xff] %vm188_vm0, %v192_v5 }
 0x135 PF: > { %s13_s11 = sadd.s32 1, %s352_s11   ;;  %s401_s9 = smov %s348_s10 }
 0x136   : > { %p10_p5 = scmp.ge.s32.totalorder %s13_s11, 4   ;;  %s402_s10 = smov %s404_s12 }
 0x138   :  { %12 = sbr.rel (!%p10_p5) target bundleno = 2 (0x2), region = 66 }

// kernel: downsample_forward.3
= control target key start
LH: loop header
LB: loop body
LE: loop exit
PB: predicated region body
PF: predicated region fallthrough
CT: control target
= control target key end

     0   :  { %11 = vsyncpa [#allocation3], 0  ;;  %s7762_s0 = inlined_call_operand.vmem [shape: f32[2,4,8,32], index: 0, kind: input, shape index: {}]   ;;  %s7763_s1 = inlined_call_operand.vmem [shape: f32[4,8,4], index: 1, kind: input, shape index: {}]   ;;  %s7764_s2 = inlined_call_operand.vmem [shape: f32[2,16,8], index: 2, kind: input, shape index: {}]   ;;  %s7765_s3 = inlined_call_operand.vmem [shape: f32[4,1], index: 3, kind: input, shape index: {}]   ;;  %s7766_s4 = inlined_call_operand.vmem [shape: f32[4,1], index: 4, kind: input, shape index: {}]   ;;  %s7767_s5 = inlined_call_operand.vmem [shape: f32[8,1], index: 5, kind: input, shape index: {}]   ;;  %s7768_s6 = inlined_call_operand.hbm [shape: f32[2,8,8,8], index: 6, kind: output, shape index: {}]  }
   0x1   :  { %13 = vsyncpa [#allocation3 + $0x1], 0  ;;  %s6853_s21 = smov 0   ;;  %s6855_s22 = smov 0  }
   0x2   :  { %s6857_s23 = smov 0   ;;  %s6859_s24 = smov 0  }
   0x3   :  { %s6861_s25 = smov 0   ;;  %s6863_s26 = smov 0  }
   0x4 LB: > { %s5853_s27 = sadd.s32 4294967295, %s6807_s26   ;;  %s5854_s28 = sadd.s32 4294967294, %s6807_s26   ;;  %s6807_s26 = sphi %s6863_s26, %s19_s26   ;;  %s6803_s25 = sphi %s6861_s25, %s7775_s25   ;;  %s6799_s24 = sphi %s6859_s24, %s7774_s24   ;;  %s6795_s23 = sphi %s6857_s23, %s7773_s23   ;;  %s6791_s22 = sphi %s6855_s22, %s7772_s22   ;;  %s6787_s21 = sphi %s6853_s21, %s7771_s21  }
   0x5   : > { %s31_s29 = sadd.s32 1, %s6803_s25  ;;  %s173_s30 = sadd.s32 1, %s6795_s23 }
   0x6   : > { %p33_p0 = scmp.ge.s32.totalorder %s31_s29, 2  ;;  %p183_p1 = scmp.ne.s32.totalorder %s6795_s23, %s6791_s22 }
   0x7   : > { %p184_p2 = scmp.eq.s32.totalorder %s5853_s27, 1  ;;  %p189_p3 = scmp.ne.s32.totalorder %s6791_s22, %s6787_s21 }
   0x8   : > { %s7777_s29 = smov (%p33_p0, %s31_s29), 0  ;;  %p190_p5 = scmp.eq.s32.totalorder %s5854_s28, 1 }
   0x9   : > { %p6893_p4 = por %p184_p2, %p183_p1  ;;  %s168_s8 = ssub.s32 %s6803_s25, %s7777_s29 }
   0xa   : > { %p5857_p6 = scmp.ge.s32.totalorder %s6807_s26, 1  ;;  %p171_p7 = scmp.eq.s32.totalorder %s168_s8, 0 }
   0xb   : > { %p6900_p8 = por %p190_p5, %p189_p3  ;;  %p234_p9 = scmp.lt.s32.totalorder %s6807_s26, 3 }
   0xc   : > { %s6906_s10 = scalar_select %p171_p7, %s6795_s23, %s173_s30  }
   0xd   : > { %p235_p10 = pnand %p5857_p6, %p234_p9 }
   0xe   : > { %v275_v0 = vld [vmem:[%s7765_s3] sm:$0xf] (!%p235_p10)  ;;  %v6809_v1 = vmov (!%p235_p10), 0   ;;  %v299_v4 = vld [vmem:[%s7764_s2 + $0x8] sm:$0xff] (!%p235_p10)  ;;  %v6810_v5 = vmov (!%p235_p10), 0.0|0.0   ;;  %vm6811_vm0 = vmmov (!%p235_p10), 0  }
   0xf   : > { %238 = sbr.rel (%p235_p10) target bundleno = 1248 (0x4e0), region = 44  ;;  %6728 = vset.pattern.permute.xlu0 (!%p235_p10), %v6809_v1  ;;  %v280_v2 = vld [vmem:[%s7766_s4] sm:$0xf] (!%p235_p10)  ;;  %6513 = vmatprep.subr.bf16.mxu0 (!%p235_p10), %v6810_v5  ;;  %v6812_v7 = vmov (!%p235_p10), 0.0   ;;  %p267_p11 = scmp.lt.s32.totalorder (!%p235_p10), %s6799_s24, 1  ;;  %vm342_vm1 = vcmask (!%p235_p10), 1041409  }
  0x10   : > { %278 = vperm.xlu0 (!%p235_p10), %6728, %v275_v0   ;;  %v298_v3 = vld [vmem:[%s7764_s2] sm:$0xff] (!%p235_p10)  ;;  %6133 = vmatprep.mubr.msk.f32.mxu0 (!%p235_p10), %vm6811_vm0, %v6812_v7  ;;  %vm345_vm2 = vcmask (!%p235_p10), 1042434   ;;  %vm348_vm3 = vcmask (!%p235_p10), 1043459   ;;  %vm350_vm4 = vcmask (!%p235_p10), 130048   ;;  %s6813_s8 = smov (!%p235_p10), 112   ;;  %vm427_vm5 = vcmask (!%p235_p10), 1043456  }
  0x11   : > { %v6921_v6 = vpack.c.bf16 (!%p235_p10), %v299_v4, %v298_v3  ;;  %6136 = vmatprep.subr.mxu1 (!%p235_p10), %v6812_v7  ;;  %6138 = vmatprep.mubr.msk.f32.mxu1 (!%p235_p10), %vm6811_vm0, %v6812_v7  ;;  %vm423_vm6 = vcmask (!%p235_p10), 31744   ;;  %s264_s11 = sand.u32 (!%p235_p10), 1, %s6791_s22   ;;  %vm1005_vm7 = vcmask (!%p235_p10), 57344   ;;  %s5968_s14 = sshll.u32 (!%p235_p10), %s6799_s24, 10 }
  0x12   : > { %s5858_s12 = sshll.u32 (!%p235_p10), %s264_s11, 6  ;;  %s7702_s18 = scalar_lea.hbm (!%p235_p10), %s7768_s6, %s5968_s14 }
  0x13   : > { %6515 = vmatpush3.bf16.msra.mxu0 (!%p235_p10), %v6921_v6  ;;  %s7370_s13 = scalar_lea.vmem (!%p235_p10), [#allocation2], %s5858_s12 }
  0x14   : > { %283 = vperm.xlu0 (!%p235_p10), %6728, %v280_v2   ;;  %6519 = vmatprep.subr.bf16.mxu0 (!%p235_p10), %v6810_v5  ;;  %s5775_s15 = sshll.u32 (!%p235_p10), %s7370_s13, 4  ;;  %s7704_s15 = int_to_ptr.vmem [resolvable:$true] %s5775_s15 }
  0x16   : > { %s268_s19 = scalar_select %p267_p11, %s6799_s24, 1 }
  0x17   : > { %s7716_s24 = scalar_lea.sflag [#allocation3], %s264_s11 }
  0x18   : > { %s5967_s20 = sshll.u32 %s268_s19, 5  ;;  %s6729_s19 = scalar_lea.vmem %s7704_s15, 1024 }
  0x19   : > { %s6935_s30 = scalar_lea.vmem %s7762_s0, %s5967_s20  ;;  %p6730_p12 = scmp.ne.s32.totalorder %s7704_s15, %s6729_s19 }
  0x1a   : > { %v1692_v8 = vld [vmem:[%s6935_s30 + $0x2] sm:$0x1]  ;;  %v1693_v9 = vld [vmem:[%s6935_s30 + $0xa] sm:$0x1]  ;;  %v1694_v10 = vld [vmem:[%s6935_s30 + $0x12] sm:$0x1] }
  0x1b   : > { %v1695_v11 = vld [vmem:[%s6935_s30 + $0x1a] sm:$0x1]  ;;  %v303_v12 = vld [vmem:[%s6935_s30] sm:$0x1]  ;;  %v304_v13 = vld [vmem:[%s6935_s30 + $0x8] sm:$0x1]  ;;  %p6731_p13 = pnand %p6730_p12, %p6893_p4 }
  0x1c   : > { %v3048_v14 = vld [vmem:[%s6935_s30 + $0x4] sm:$0x1]  ;;  %v1014_v15 = vld [vmem:[%s6935_s30 + $0x1] sm:$0x1]  ;;  %v4404_v16 = vld [vmem:[%s6935_s30 + $0x6] sm:$0x1] }
  0x1d   : > { %v305_v18 = vld [vmem:[%s6935_s30 + $0x10] sm:$0x1]  ;;  %v306_v19 = vld [vmem:[%s6935_s30 + $0x18] sm:$0x1]  ;;  %v3049_v20 = vld [vmem:[%s6935_s30 + $0xc] sm:$0x1]  ;;  %p6732_p0 = pneg %p6731_p13 }
  0x1e   : > { %v3050_v25 = vld [vmem:[%s6935_s30 + $0x14] sm:$0x1]  ;;  %v3051_v34 = vld [vmem:[%s6935_s30 + $0x1c] sm:$0x1]  ;;  %v1015_v35 = vld [vmem:[%s6935_s30 + $0x9] sm:$0x1] }
  0x1f   : > { %s6815_s20 = smov [#allocation2]  }
  0x20   : > { %s6733_s27 = sshll.u32 %s6815_s20, 4  ;;  %s6734_s27 = int_to_ptr.vmem [resolvable:$false] %s6733_s27 }
  0x21   : > { %s6735_s28 = scalar_lea.vmem %s6734_s27, 2048  ;;  %p6736_p1 = scmp.lt.s32.totalorder %s7704_s15, %s6734_s27 }
  0x22   : > { %p6737_p2 = scmp.lt.s32.totalorder %s6735_s28, %s6729_s19 }
  0x24   : > { %p6738_p3 = por %p6737_p2, %p6736_p1 }
  0x26   : > { %p6739_p5 = pnand %p6738_p3, %p6732_p0 }
  0x8f   : > { %v6946_v17 = vpop.permute.xlu0 %278 }
  0x90   : > { %v6952_v21 = vrot.slane %v6946_v17, 1  ;;  %v6955_v22 = vrot.slane %v6946_v17, 2  ;;  %v6958_v23 = vrot.slane %v6946_v17, 3  ;;  %v1696_v24 = vmul.f32 %v1692_v8, %v6946_v17 }
  0x91   : > { %v314_v26 = vmul.f32 %v303_v12, %v6946_v17  ;;  %v3052_v27 = vmul.f32 %v3048_v14, %v6946_v17  ;;  %v6965_v28 = vmul.f32 %v1014_v15, %v6946_v17  ;;  %v6968_v29 = vmul.f32 %v4404_v16, %v6946_v17  ;;  %v1016_v12 = vld [vmem:[%s6935_s30 + $0x11] sm:$0x1] }
  0x92   : > { %v1697_v30 = vmul.f32 %v1693_v9, %v6952_v21  ;;  %v1698_v31 = vmul.f32 %v1694_v10, %v6955_v22  ;;  %v1699_v32 = vmul.f32 %v1695_v11, %v6958_v23  ;;  %v315_v33 = vmul.f32 %v6952_v21, %v304_v13 }
  0x93   : > { %v6976_v36 = vpop.permute.xlu0 %283  ;;  %v316_v37 = vmul.f32 %v6955_v22, %v305_v18  ;;  %v317_v38 = vmul.f32 %v6958_v23, %v306_v19  ;;  %v3053_v39 = vmul.f32 %v3049_v20, %v6952_v21  ;;  %v3054_v40 = vmul.f32 %v3050_v25, %v6955_v22  ;;  %v1017_v18 = vld [vmem:[%s6935_s30 + $0x19] sm:$0x1] }
  0x94   : > { %v6983_v41 = vrot.slane %v6976_v36, 1  ;;  %v6986_v42 = vrot.slane %v6976_v36, 2  ;;  %v6989_v43 = vrot.slane %v6976_v36, 3  ;;  %v1700_v44 = vadd.f32 %v1696_v24, %v6976_v36 }
  0x95   : > { %v325_v45 = vadd.f32 %v314_v26, %v6976_v36  ;;  %v3055_v46 = vmul.f32 %v3051_v34, %v6958_v23  ;;  %v6995_v47 = vadd.f32 %v3052_v27, %v6976_v36  ;;  %v1019_v48 = vmul.f32 %v1015_v35, %v6952_v21 }
  0x96   : > { %v1701_v49 = vadd.f32 %v1697_v30, %v6983_v41  ;;  %v1702_v50 = vadd.f32 %v1698_v31, %v6986_v42  ;;  %v1703_v51 = vadd.f32 %v1699_v32, %v6989_v43  ;;  %v1704_v52 = vmul.f32 0.01, %v1700_v44 }
  0x97   : > { %v326_v53 = vadd.f32 %v6983_v41, %v315_v33  ;;  %v327_v54 = vadd.f32 %v6986_v42, %v316_v37  ;;  %v328_v55 = vadd.f32 %v6989_v43, %v317_v38  ;;  %v329_v56 = vmul.f32 0.01, %v325_v45 }
  0x98   : > { %v1705_v57 = vmul.f32 0.01, %v1701_v49  ;;  %v1706_v58 = vmul.f32 0.01, %v1702_v50  ;;  %v1707_v59 = vmul.f32 0.01, %v1703_v51  ;;  %v1708_v60 = vmax.f32 %v1700_v44, %v1704_v52 }
  0x99   : > { %v330_v61 = vmul.f32 0.01, %v326_v53  ;;  %v331_v62 = vmul.f32 0.01, %v327_v54  ;;  %v332_v63 = vmul.f32 0.01, %v328_v55  ;;  %v333_v0 = vmax.f32 %v325_v45, %v329_v56 }
  0x9a   : > { %v1709_v1 = vmax.f32 %v1701_v49, %v1705_v57  ;;  %v1710_v2 = vmax.f32 %v1702_v50, %v1706_v58  ;;  %v1711_v3 = vmax.f32 %v1703_v51, %v1707_v59  ;;  %v3057_v4 = vadd.f32 %v3053_v39, %v6983_v41  ;;  %v4405_v44 = vld [vmem:[%s6935_s30 + $0xe] sm:$0x1]  ;;  %v4406_v50 = vld [vmem:[%s6935_s30 + $0x16] sm:$0x1] }
  0x9b   : > { %v334_v8 = vmax.f32 %v326_v53, %v330_v61  ;;  %v335_v9 = vmax.f32 %v327_v54, %v331_v62  ;;  %v336_v10 = vmax.f32 %v328_v55, %v332_v63  ;;  %v3058_v11 = vadd.f32 %v3054_v40, %v6986_v42  ;;  %v4407_v55 = vld [vmem:[%s6935_s30 + $0x1e] sm:$0x1] }
  0x9c   : > { %v1716_v13 = vrot.slane %v1709_v1, 7  ;;  %v1718_v14 = vrot.slane %v1710_v2, 6  ;;  %v1720_v15 = vrot.slane %v1711_v3, 5  ;;  %v3059_v16 = vadd.f32 %v3055_v46, %v6989_v43  ;;  %v2370_v2 = vld [vmem:[%s6935_s30 + $0x3] sm:$0x1] }
  0x9d   : > { %v341_v19 = vrot.slane %v334_v8, 7  ;;  %v344_v20 = vrot.slane %v335_v9, 6  ;;  %v347_v24 = vrot.slane %v336_v10, 5  ;;  %v3060_v25 = vmul.f32 0.01, %v6995_v47 }
  0x9e   : > { %v1717_v26 = vsel %vm342_vm1, %v1716_v13, %v1708_v60  ;;  %v3061_v27 = vmul.f32 0.01, %v3057_v4  ;;  %v3062_v30 = vmul.f32 0.01, %v3058_v11  ;;  %v3063_v31 = vmul.f32 0.01, %v3059_v16 }
  0x9f   : > { %v1719_v32 = vsel %vm345_vm2, %v1718_v14, %v1717_v26  ;;  %v343_v33 = vsel %vm342_vm1, %v341_v19, %v333_v0  ;;  %v3064_v34 = vmax.f32 %v6995_v47, %v3060_v25  ;;  %v1020_v35 = vmul.f32 %v1016_v12, %v6955_v22  ;;  %v2371_v10 = vld [vmem:[%s6935_s30 + $0xb] sm:$0x1] }
  0xa0   : > { %v7016_v37 = vsel %vm348_vm3, %v1720_v15, %v1719_v32  ;;  %v346_v38 = vsel %vm345_vm2, %v344_v20, %v343_v33  ;;  %v3065_v39 = vmax.f32 %v3057_v4, %v3061_v27  ;;  %v3066_v40 = vmax.f32 %v3058_v11, %v3062_v30  ;;  %v2372_v15 = vld [vmem:[%s6935_s30 + $0x13] sm:$0x1]  ;;  %v2373_v20 = vld [vmem:[%s6935_s30 + $0x1b] sm:$0x1] }
  0xa1   : > { %2012 = vrot.lane.b32.xlu0 %v7016_v37, %s6813_s8  ;;  %v7023_v45 = vsel %vm348_vm3, %v347_v24, %v346_v38  ;;  %v3067_v46 = vmax.f32 %v3059_v16, %v3063_v31  ;;  %v1021_v47 = vmul.f32 %v1017_v18, %v6958_v23  ;;  %v1022_v49 = vadd.f32 %v6965_v28, %v6976_v36 }
  0xa2   : > { %649 = vrot.lane.b32.xlu1 %v7023_v45, %s6813_s8  ;;  %6134 = vmatmul.mubr.msk.f32.vlgmr.msra.gmra.mrb[0].mxu0 %vm350_vm4, %v7023_v45  ;;  %v3072_v51 = vrot.slane %v3065_v39, 7  ;;  %v3074_v52 = vrot.slane %v3066_v40, 6  ;;  %v1023_v53 = vadd.f32 %v1019_v48, %v6983_v41  ;;  %v1024_v54 = vadd.f32 %v1020_v35, %v6986_v42  ;;  %v3726_v40 = vld [vmem:[%s6935_s30 + $0x5] sm:$0x1] }
  0xa3   : > { %v3076_v56 = vrot.slane %v3067_v46, 5  ;;  %v1025_v57 = vadd.f32 %v1021_v47, %v6989_v43  ;;  %v1026_v58 = vmul.f32 0.01, %v1022_v49  ;;  %v4409_v28 = vmul.f32 %v4405_v44, %v6952_v21  ;;  %6521 = vmatpush3.bf16.msra.mxu0 %v6921_v6  ;;  %6157 = vmatprep.mubr.msk.f32.mxu0 %vm6811_vm0, %v6812_v7 }
  0xa4   : > { %v3073_v59 = vsel %vm342_vm1, %v3072_v51, %v3064_v34  ;;  %v1027_v60 = vmul.f32 0.01, %v1023_v53  ;;  %v1028_v48 = vmul.f32 0.01, %v1024_v54  ;;  %v4410_v61 = vmul.f32 %v4406_v50, %v6955_v22  ;;  %6522 = vmatprep.subr.bf16.mxu0 %v6810_v5  ;;  %v3727_v50 = vld [vmem:[%s6935_s30 + $0xd] sm:$0x1] }
  0xa5   : > { %v3075_v62 = vsel %vm345_vm2, %v3074_v52, %v3073_v59  ;;  %v1029_v63 = vmul.f32 0.01, %v1025_v57  ;;  %v1030_v0 = vmax.f32 %v1022_v49, %v1026_v58  ;;  %v4411_v1 = vmul.f32 %v4407_v55, %v6958_v23  ;;  %v3728_v55 = vld [vmem:[%s6935_s30 + $0x15] sm:$0x1] }
  0xa6   : > { %v7048_v3 = vsel %vm348_vm3, %v3076_v56, %v3075_v62  ;;  %v1031_v4 = vmax.f32 %v1023_v53, %v1027_v60  ;;  %v1032_v8 = vmax.f32 %v1024_v54, %v1028_v48  ;;  %v4412_v9 = vadd.f32 %v6968_v29, %v6976_v36  ;;  %v3729_v56 = vld [vmem:[%s6935_s30 + $0x1d] sm:$0x1] }
  0xa7   : > { %3368 = vrot.lane.b32.xlu0 %v7048_v3, %s6813_s8  ;;  %v1033_v11 = vmax.f32 %v1025_v57, %v1029_v63  ;;  %v4413_v12 = vadd.f32 %v4409_v28, %v6983_v41  ;;  %v4414_v13 = vadd.f32 %v4410_v61, %v6986_v42  ;;  %v4415_v14 = vadd.f32 %v4411_v1, %v6989_v43 }
  0xa8   : > { %v1038_v16 = vrot.slane %v1031_v4, 7  ;;  %v1040_v18 = vrot.slane %v1032_v8, 6  ;;  %v4416_v19 = vmul.f32 0.01, %v4412_v9  ;;  %v2374_v24 = vmul.f32 %v2370_v2, %v6946_v17 }
  0xa9   : > { %v1042_v29 = vrot.slane %v1033_v11, 5  ;;  %v4417_v25 = vmul.f32 0.01, %v4413_v12  ;;  %v4418_v26 = vmul.f32 0.01, %v4414_v13  ;;  %v2375_v27 = vmul.f32 %v2371_v10, %v6952_v21 }
  0xaa   : > { %v1039_v30 = vsel %vm342_vm1, %v1038_v16, %v1030_v0  ;;  %v4419_v31 = vmul.f32 0.01, %v4415_v14  ;;  %v4420_v32 = vmax.f32 %v4412_v9, %v4416_v19  ;;  %v2376_v33 = vmul.f32 %v2372_v15, %v6955_v22  ;;  %v5082_v11 = vld [vmem:[%s6935_s30 + $0x7] sm:$0x1]  ;;  %v5083_v16 = vld [vmem:[%s6935_s30 + $0xf] sm:$0x1] }
  0xab   : > { %v1041_v34 = vsel %vm345_vm2, %v1040_v18, %v1039_v30  ;;  %v4421_v35 = vmax.f32 %v4413_v12, %v4417_v25  ;;  %v4422_v38 = vmax.f32 %v4414_v13, %v4418_v26  ;;  %v2377_v39 = vmul.f32 %v2373_v20, %v6958_v23  ;;  %v5084_v18 = vld [vmem:[%s6935_s30 + $0x17] sm:$0x1]  ;;  %v5085_v25 = vld [vmem:[%s6935_s30 + $0x1f] sm:$0x1] }
  0xac   : > { %v7068_v44 = vsel %vm348_vm3, %v1042_v29, %v1041_v34  ;;  %v4423_v46 = vmax.f32 %v4415_v14, %v4419_v31  ;;  %v2378_v47 = vadd.f32 %v2374_v24, %v6976_v36  ;;  %v2379_v49 = vadd.f32 %v2375_v27, %v6983_v41  ;;  %v285_v24 = vld [vmem:[%s7767_s5] sm:$0xff] }
  0xad   : > { %1334 = vrot.lane.b32.xlu1 %v7068_v44, %s6813_s8  ;;  %v4428_v51 = vrot.slane %v4421_v35, 7  ;;  %v4430_v52 = vrot.slane %v4422_v38, 6  ;;  %v2380_v53 = vadd.f32 %v2376_v33, %v6986_v42  ;;  %v2381_v54 = vadd.f32 %v2377_v39, %v6989_v43 }
  0xae   : > { %v4432_v57 = vrot.slane %v4423_v46, 5  ;;  %v2382_v58 = vmul.f32 0.01, %v2378_v47  ;;  %v2383_v28 = vmul.f32 0.01, %v2379_v49  ;;  %v3730_v59 = vmul.f32 %v3726_v40, %v6946_v17 }
  0xaf   : > { %v4429_v60 = vsel %vm342_vm1, %v4428_v51, %v4420_v32  ;;  %v2384_v48 = vmul.f32 0.01, %v2380_v53  ;;  %v2385_v61 = vmul.f32 0.01, %v2381_v54  ;;  %v3731_v62 = vmul.f32 %v3727_v50, %v6952_v21 }
  0xb0   : > { %v4431_v63 = vsel %vm345_vm2, %v4430_v52, %v4429_v60  ;;  %v2386_v0 = vmax.f32 %v2378_v47, %v2382_v58  ;;  %v2387_v1 = vmax.f32 %v2379_v49, %v2383_v28  ;;  %v3732_v2 = vmul.f32 %v3728_v55, %v6955_v22 }
  0xb1   : > { %v7085_v4 = vsel %vm348_vm3, %v4432_v57, %v4431_v63  ;;  %v2388_v8 = vmax.f32 %v2380_v53, %v2384_v48  ;;  %v2389_v9 = vmax.f32 %v2381_v54, %v2385_v61  ;;  %v3733_v10 = vmul.f32 %v3729_v56, %v6958_v23 }
  0xb2   : > { %4724 = vrot.lane.b32.xlu0 %v7085_v4, %s6813_s8  ;;  %v2394_v12 = vrot.slane %v2387_v1, 7  ;;  %v3734_v13 = vadd.f32 %v3730_v59, %v6976_v36  ;;  %v3735_v14 = vadd.f32 %v3731_v62, %v6983_v41  ;;  %v3736_v15 = vadd.f32 %v3732_v2, %v6986_v42  ;;  %v5864_v1 = vld [vmem:[%s7764_s2 + $0x10] sm:$0xff]  ;;  %v5865_v2 = vld [vmem:[%s7764_s2 + $0x18] sm:$0xff] }
  0xb3   : > { %v2396_v19 = vrot.slane %v2388_v8, 6  ;;  %v2398_v20 = vrot.slane %v2389_v9, 5  ;;  %v3737_v29 = vadd.f32 %v3733_v10, %v6989_v43  ;;  %v5086_v34 = vmul.f32 %v5082_v11, %v6946_v17  ;;  %v7155_v10 = vld [vmem:[%s7763_s1] sm:$0xff] }
  0xb4   : > { %v2395_v26 = vsel %vm342_vm1, %v2394_v12, %v2386_v0  ;;  %v3738_v27 = vmul.f32 0.01, %v3734_v13  ;;  %v3739_v30 = vmul.f32 0.01, %v3735_v14  ;;  %v3740_v31 = vmul.f32 0.01, %v3736_v15 }
  0xb5   : > { %v2397_v32 = vsel %vm345_vm2, %v2396_v19, %v2395_v26  ;;  %v3741_v33 = vmul.f32 0.01, %v3737_v29  ;;  %v5087_v35 = vmul.f32 %v5083_v16, %v6952_v21  ;;  %v5088_v46 = vmul.f32 %v5084_v18, %v6955_v22 }
  0xb6   : > { %v7106_v38 = vsel %vm348_vm3, %v2398_v20, %v2397_v32  ;;  %288 = vperm.xlu0 %6728, %v285_v24   ;;  %v3743_v39 = vmax.f32 %v3735_v14, %v3739_v30  ;;  %v3744_v40 = vmax.f32 %v3736_v15, %v3740_v31  ;;  %v5089_v49 = vmul.f32 %v5085_v25, %v6958_v23  ;;  %v7202_v25 = vld [vmem:[%s7763_s1 + $0x18] sm:$0xff] }
  0xb7   : > { %2690 = vrot.lane.b32.xlu1 %v7106_v38, %s6813_s8  ;;  %v3745_v47 = vmax.f32 %v3737_v29, %v3741_v33  ;;  %v5090_v50 = vadd.f32 %v5086_v34, %v6976_v36  ;;  %v5091_v17 = vadd.f32 %v5087_v35, %v6983_v41  ;;  %v3742_v51 = vmax.f32 %v3734_v13, %v3738_v27  ;;  %v7191_v29 = vld [vmem:[%s7763_s1 + $0x10] sm:$0xff] }
  0xb8   : > { %v3750_v21 = vrot.slane %v3743_v39, 7  ;;  %v3752_v52 = vrot.slane %v3744_v40, 6  ;;  %v5092_v53 = vadd.f32 %v5088_v46, %v6986_v42  ;;  %v5093_v54 = vadd.f32 %v5089_v49, %v6989_v43 }
  0xb9   : > { %v5094_v55 = vmul.f32 0.01, %v5090_v50  ;;  %v5095_v56 = vmul.f32 0.01, %v5091_v17  ;;  %v3754_v57 = vrot.slane %v3745_v47, 5  ;;  %v7136_v8 = vpack.c.bf16 %v5865_v2, %v5864_v1 }
  0xba   : > { %v3751_v22 = vsel %vm342_vm1, %v3750_v21, %v3742_v51  ;;  %v5096_v58 = vmul.f32 0.01, %v5092_v53  ;;  %v5097_v23 = vmul.f32 0.01, %v5093_v54  ;;  %v6814_v31 = vmov 1966171168  }
  0xbb   : > { %v3753_v28 = vsel %vm345_vm2, %v3752_v52, %v3751_v22  ;;  %v5099_v59 = vmax.f32 %v5091_v17, %v5095_v56  ;;  %v5098_v42 = vmax.f32 %v5090_v50, %v5094_v55  ;;  %v950_v32 = vunpack.c.l.s4 %v6814_v31 }
  0xbc   : > { %v7119_v36 = vsel %vm348_vm3, %v3754_v57, %v3753_v28  ;;  %v5100_v41 = vmax.f32 %v5092_v53, %v5096_v58  ;;  %v5101_v60 = vmax.f32 %v5093_v54, %v5097_v23  ;;  %v952_v33 = vlaneseq }
  0xbd   : > { %4046 = vrot.lane.b32.xlu1 %v7119_v36, %s6813_s8  ;;  %v5106_v43 = vrot.slane %v5099_v59, 7 }
  0xbe   : > { %v5108_v48 = vrot.slane %v5100_v41, 6  ;;  %v5110_v62 = vrot.slane %v5101_v60, 5  ;;  %v953_v34 = vshrl.u32 %v952_v33, 7 }
  0xbf   : > { %v5107_v61 = vsel %vm342_vm1, %v5106_v43, %v5098_v42 }
  0xc0   : > { %v5109_v63 = vsel %vm345_vm2, %v5108_v48, %v5107_v61 }
  0xc1   : > { %v7126_v0 = vsel %vm348_vm3, %v5110_v62, %v5109_v63 }
  0xc2   : > { %5402 = vrot.lane.b32.xlu1 %v7126_v0, %s6813_s8 }
 0x114   : > { %v650_v9 = vpop.permute.xlu1 %649 }
 0x115   : > { %6158 = vmatmul.mubr.msk.f32.vlgmr.msra.gmra.mrb[2].mxu0 %vm350_vm4, %v650_v9 }
 0x116   : > { %6524 = vmatpush3.bf16.msra.mxu0 %v7136_v8  ;;  %6169 = vmatprep.mubr.msk.f32.mxu0 %vm6811_vm0, %v6812_v7 }
 0x117   : > { %6525 = vmatprep.subr.bf16.mxu0 %v6810_v5 }
 0x119   : > { %6170 = vmatmul.mubr.msk.f32.vlgmr.msra.gmra.mrb[4].mxu0 %vm350_vm4, %v650_v9 }
 0x11a   : > { %6527 = vmatpush3.bf16.msra.mxu0 %v6921_v6  ;;  %6181 = vmatprep.mubr.msk.f32.mxu0 %vm6811_vm0, %v6812_v7 }
 0x11b   : > { %6184 = vmatprep.subr.mxu0 %v6812_v7 }
 0x11d   : > { %6182 = vmatmul.mubr.msk.f32.vlgmr.msra.gmra.mrb[6].mxu0 %vm350_vm4, %v7068_v44 }
 0x11e   : > { %6186 = vmatprep.mubr.msk.f32.mxu0 %vm6811_vm0, %v6812_v7 }
 0x11f   : > { %v1335_v26 = vpop.permute.xlu1 %1334 }
 0x175   : > { %v419_v11 = vpop.f32.mrb[0].mxu0 }
 0x176   : > { %v6135_v12 = vpop.f32.mrb[1].mxu0  ;;  %6137 = vmatpush3.msk.msra.mxu1 %vm427_vm5, %v419_v11 }
 0x177   : > { %6139 = vmatmul.mubr.msk.f32.vlgmr.msra.gmra.mrb[0].mxu1 %vm423_vm6, %v7155_v10  ;;  %6516 = vmatprep.subr.bf16.mxu1 %v6810_v5 }
 0x178   : > { %6518 = vmatpush3.bf16.msra.mxu1 %v7136_v8  ;;  %6145 = vmatprep.mubr.msk.f32.mxu1 %vm6811_vm0, %v6812_v7 }
 0x179   : > { %6148 = vmatprep.subr.mxu1 %v6812_v7 }
 0x17b   : > { %6146 = vmatmul.mubr.msk.f32.vlgmr.msra.gmra.mrb[2].mxu1 %vm350_vm4, %v7023_v45  ;;  %v7178_v45 = vld [vmem:[%s7763_s1 + $0x8] sm:$0xff] }
 0x17c   : > { %6150 = vmatprep.mubr.msk.f32.mxu1 %vm6811_vm0, %v6812_v7 }
 0x1e8   : > { %v719_v13 = vpop.f32.mrb[2].mxu0 }
 0x1e9   : > { %v6159_v14 = vpop.f32.mrb[3].mxu0 }
 0x1ec   : > { %v866_v15 = vpop.f32.mrb[4].mxu0 }
 0x1ed   : > { %v6171_v16 = vpop.f32.mrb[5].mxu0 }
 0x1f0   : > { %v1112_v18 = vpop.f32.mrb[6].mxu0 }
 0x1f1   : > { %v6183_v19 = vpop.f32.mrb[7].mxu0  ;;  %6185 = vmatpush3.msk.msra.mxu0 %vm427_vm5, %v1112_v18 }
 0x1f2   : > { %6187 = vmatmul.mubr.msk.f32.vlgmr.msra.gmra.mrb[8].mxu0 %vm423_vm6, %v7155_v10  ;;  %6196 = vmatprep.subr.mxu0 %v6812_v7 }
 0x1f3   : > { %6198 = vmatprep.mubr.msk.f32.mxu0 %vm6811_vm0, %v6812_v7 }
 0x24e   : > { %v568_v20 = vpop.f32.mrb[2].mxu1 }
 0x24f   : > { %v6147_v24 = vpop.f32.mrb[3].mxu1  ;;  %6149 = vmatpush3.msk.msra.mxu1 %vm427_vm5, %v568_v20 }
 0x250   : > { %6151 = vmatmul.mubr.msk.f32.vlgmr.msra.gmra.mrb[0].mxu1 %vm423_vm6, %v7178_v45  ;;  %6160 = vmatprep.subr.mxu1 %v6812_v7 }
 0x251   : > { %6161 = vmatpush3.msk.msra.mxu1 %vm427_vm5, %v719_v13  ;;  %6162 = vmatprep.mubr.msk.f32.mxu1 %vm6811_vm0, %v6812_v7 }
 0x252   : > { %6172 = vmatprep.subr.mxu1 %v6812_v7 }
 0x258   : > { %6163 = vmatmul.mubr.msk.f32.vlgmr.msra.gmra.mrb[0].mxu1 %vm423_vm6, %v7191_v29 }
 0x259   : > { %6173 = vmatpush3.msk.msra.mxu1 %vm427_vm5, %v866_v15  ;;  %6174 = vmatprep.mubr.msk.f32.mxu1 %vm6811_vm0, %v6812_v7 }
 0x25a   : > { %6528 = vmatprep.subr.bf16.mxu1 %v6810_v5 }
 0x260   : > { %6175 = vmatmul.mubr.msk.f32.vlgmr.msra.gmra.mrb[0].mxu1 %vm423_vm6, %v7202_v25 }
 0x261   : > { %6530 = vmatpush3.bf16.msra.mxu1 %v7136_v8  ;;  %6193 = vmatprep.mubr.msk.f32.mxu1 %vm6811_vm0, %v6812_v7 }
 0x262   : > { %6531 = vmatprep.subr.bf16.mxu1 %v6810_v5 }
 0x264   : > { %6194 = vmatmul.mubr.msk.f32.vlgmr.msra.gmra.mrb[4].mxu1 %vm350_vm4, %v7068_v44  ;;  %v2013_v44 = vpop.permute.xlu0 %2012 }
 0x265   : > { %6533 = vmatpush3.bf16.msra.mxu1 %v6921_v6  ;;  %6205 = vmatprep.mubr.msk.f32.mxu1 %vm6811_vm0, %v6812_v7 }
 0x266   : > { %6534 = vmatprep.subr.bf16.mxu1 %v6810_v5 }
 0x268   : > { %6206 = vmatmul.mubr.msk.f32.vlgmr.msra.gmra.mrb[6].mxu1 %vm350_vm4, %v1335_v26  ;;  %v3369_v27 = vpop.permute.xlu0 %3368 }
 0x269   : > { %6536 = vmatpush3.bf16.msra.mxu1 %v7136_v8  ;;  %6217 = vmatprep.mubr.msk.f32.mxu1 %vm6811_vm0, %v6812_v7 }
 0x26a   : > { %6537 = vmatprep.subr.bf16.mxu1 %v6810_v5 }
 0x26c   : > { %6218 = vmatmul.mubr.msk.f32.vlgmr.msra.gmra.mrb[8].mxu1 %vm350_vm4, %v1335_v26  ;;  %v4725_v30 = vpop.permute.xlu0 %4724 }
 0x26d   : > { %6539 = vmatpush3.bf16.msra.mxu1 %v6921_v6  ;;  %6229 = vmatprep.mubr.msk.f32.mxu1 %vm6811_vm0, %v6812_v7 }
 0x26e   : > { %6540 = vmatprep.subr.bf16.mxu1 %v6810_v5 }
 0x270   : > { %6230 = vmatmul.mubr.msk.f32.vlgmr.msra.gmra.mrb[10].mxu1 %vm350_vm4, %v7016_v37 }
 0x271   : > { %6542 = vmatpush3.bf16.msra.mxu1 %v7136_v8  ;;  %6241 = vmatprep.mubr.msk.f32.mxu1 %vm6811_vm0, %v6812_v7 }
 0x272   : > { %6543 = vmatprep.subr.bf16.mxu1 %v6810_v5 }
 0x274   : > { %6242 = vmatmul.mubr.msk.f32.vlgmr.msra.gmra.mrb[12].mxu1 %vm350_vm4, %v7016_v37  ;;  %v2691_v37 = vpop.permute.xlu1 %2690 }
 0x275   : > { %6545 = vmatpush3.bf16.msra.mxu1 %v6921_v6  ;;  %6253 = vmatprep.mubr.msk.f32.mxu1 %vm6811_vm0, %v6812_v7 }
 0x276   : > { %6546 = vmatprep.subr.bf16.mxu1 %v6810_v5 }
 0x278   : > { %6254 = vmatmul.mubr.msk.f32.vlgmr.msra.gmra.mrb[14].mxu1 %vm350_vm4, %v2013_v44 }
 0x279   : > { %6548 = vmatpush3.bf16.msra.mxu1 %v7136_v8  ;;  %6265 = vmatprep.mubr.msk.f32.mxu1 %vm6811_vm0, %v6812_v7 }
 0x27a   : > { %6549 = vmatprep.subr.bf16.mxu1 %v6810_v5 }
 0x27c   : > { %6266 = vmatmul.mubr.msk.f32.vlgmr.msra.gmra.mrb[16].mxu1 %vm350_vm4, %v2013_v44 }
 0x27d   : > { %6551 = vmatpush3.bf16.msra.mxu1 %v6921_v6  ;;  %6277 = vmatprep.mubr.msk.f32.mxu1 %vm6811_vm0, %v6812_v7 }
 0x27e   : > { %6552 = vmatprep.subr.bf16.mxu1 %v6810_v5 }
 0x280   : > { %6278 = vmatmul.mubr.msk.f32.vlgmr.msra.gmra.mrb[18].mxu1 %vm350_vm4, %v7106_v38 }
 0x281   : > { %6554 = vmatpush3.bf16.msra.mxu1 %v7136_v8  ;;  %6289 = vmatprep.mubr.msk.f32.mxu1 %vm6811_vm0, %v6812_v7 }
 0x282   : > { %6555 = vmatprep.subr.bf16.mxu1 %v6810_v5 }
 0x284   : > { %6290 = vmatmul.mubr.msk.f32.vlgmr.msra.gmra.mrb[20].mxu1 %vm350_vm4, %v7106_v38  ;;  %v7356_v38 = vpop.permute.xlu0 %288 }
 0x285   : > { %6557 = vmatpush3.bf16.msra.mxu1 %v6921_v6  ;;  %6301 = vmatprep.mubr.msk.f32.mxu1 %vm6811_vm0, %v6812_v7 }
 0x286   : > { %6558 = vmatprep.subr.bf16.mxu1 %v6810_v5 }
 0x288   : > { %6302 = vmatmul.mubr.msk.f32.vlgmr.msra.gmra.mrb[22].mxu1 %vm350_vm4, %v2691_v37 }
 0x289   : > { %6560 = vmatpush3.bf16.msra.mxu1 %v7136_v8  ;;  %6313 = vmatprep.mubr.msk.f32.mxu1 %vm6811_vm0, %v6812_v7 }
 0x28a   : > { %6561 = vmatprep.subr.bf16.mxu1 %v6810_v5 }
 0x28c   : > { %6314 = vmatmul.mubr.msk.f32.vlgmr.msra.gmra.mrb[24].mxu1 %vm350_vm4, %v2691_v37 }
 0x28d   : > { %6563 = vmatpush3.bf16.msra.mxu1 %v6921_v6  ;;  %6325 = vmatprep.mubr.msk.f32.mxu1 %vm6811_vm0, %v6812_v7 }
 0x28e   : > { %6564 = vmatprep.subr.bf16.mxu1 %v6810_v5 }
 0x290   : > { %6326 = vmatmul.mubr.msk.f32.vlgmr.msra.gmra.mrb[26].mxu1 %vm350_vm4, %v7048_v3 }
 0x291   : > { %6566 = vmatpush3.bf16.msra.mxu1 %v7136_v8  ;;  %6337 = vmatprep.mubr.msk.f32.mxu1 %vm6811_vm0, %v6812_v7 }
 0x292   : > { %6567 = vmatprep.subr.bf16.mxu1 %v6810_v5 }
 0x294   : > { %6338 = vmatmul.mubr.msk.f32.vlgmr.msra.gmra.mrb[28].mxu1 %vm350_vm4, %v7048_v3  ;;  %v4047_v3 = vpop.permute.xlu1 %4046 }
 0x295   : > { %6569 = vmatpush3.bf16.msra.mxu1 %v6921_v6  ;;  %6349 = vmatprep.mubr.msk.f32.mxu1 %vm6811_vm0, %v6812_v7 }
 0x296   : > { %6570 = vmatprep.subr.bf16.mxu1 %v6810_v5 }
 0x298   : > { %6350 = vmatmul.mubr.msk.f32.vlgmr.msra.gmra.mrb[30].mxu1 %vm350_vm4, %v3369_v27 }
 0x299   : > { %6572 = vmatpush3.bf16.msra.mxu1 %v7136_v8  ;;  %6361 = vmatprep.mubr.msk.f32.mxu1 %vm6811_vm0, %v6812_v7 }
 0x29a   : > { %6573 = vmatprep.subr.bf16.mxu1 %v6810_v5 }
 0x29c   : > { %6362 = vmatmul.mubr.msk.f32.vlgmr.msra.gmra.mrb[32].mxu1 %vm350_vm4, %v3369_v27 }
 0x29d   : > { %6575 = vmatpush3.bf16.msra.mxu1 %v6921_v6  ;;  %6373 = vmatprep.mubr.msk.f32.mxu1 %vm6811_vm0, %v6812_v7 }
 0x29e   : > { %6576 = vmatprep.subr.bf16.mxu1 %v6810_v5 }
 0x2a0   : > { %6374 = vmatmul.mubr.msk.f32.vlgmr.msra.gmra.mrb[34].mxu1 %vm350_vm4, %v7119_v36 }
 0x2a1   : > { %6578 = vmatpush3.bf16.msra.mxu1 %v7136_v8  ;;  %6385 = vmatprep.mubr.msk.f32.mxu1 %vm6811_vm0, %v6812_v7 }
 0x2a2   : > { %6579 = vmatprep.subr.bf16.mxu1 %v6810_v5 }
 0x2a4   : > { %6386 = vmatmul.mubr.msk.f32.vlgmr.msra.gmra.mrb[36].mxu1 %vm350_vm4, %v7119_v36 }
 0x2a5   : > { %6581 = vmatpush3.bf16.msra.mxu1 %v6921_v6  ;;  %6397 = vmatprep.mubr.msk.f32.mxu1 %vm6811_vm0, %v6812_v7 }
 0x2a6   : > { %6582 = vmatprep.subr.bf16.mxu1 %v6810_v5 }
 0x2a8   : > { %6398 = vmatmul.mubr.msk.f32.vlgmr.msra.gmra.mrb[38].mxu1 %vm350_vm4, %v4047_v3 }
 0x2a9   : > { %6584 = vmatpush3.bf16.msra.mxu1 %v7136_v8  ;;  %6409 = vmatprep.mubr.msk.f32.mxu1 %vm6811_vm0, %v6812_v7 }
 0x2aa   : > { %6585 = vmatprep.subr.bf16.mxu1 %v6810_v5 }
 0x2ac   : > { %6410 = vmatmul.mubr.msk.f32.vlgmr.msra.gmra.mrb[40].mxu1 %vm350_vm4, %v4047_v3 }
 0x2ad   : > { %6587 = vmatpush3.bf16.msra.mxu1 %v6921_v6  ;;  %6421 = vmatprep.mubr.msk.f32.mxu1 %vm6811_vm0, %v6812_v7 }
 0x2ae   : > { %6588 = vmatprep.subr.bf16.mxu1 %v6810_v5 }
 0x2b0   : > { %6422 = vmatmul.mubr.msk.f32.vlgmr.msra.gmra.mrb[42].mxu1 %vm350_vm4, %v7085_v4 }
 0x2b1   : > { %6590 = vmatpush3.bf16.msra.mxu1 %v7136_v8  ;;  %6433 = vmatprep.mubr.msk.f32.mxu1 %vm6811_vm0, %v6812_v7 }
 0x2b2   : > { %6591 = vmatprep.subr.bf16.mxu1 %v6810_v5 }
 0x2b4   : > { %6434 = vmatmul.mubr.msk.f32.vlgmr.msra.gmra.mrb[44].mxu1 %vm350_vm4, %v7085_v4  ;;  %v5403_v4 = vpop.permute.xlu1 %5402 }
 0x2b5   : > { %6593 = vmatpush3.bf16.msra.mxu1 %v6921_v6  ;;  %6445 = vmatprep.mubr.msk.f32.mxu1 %vm6811_vm0, %v6812_v7 }
 0x2b6   : > { %6594 = vmatprep.subr.bf16.mxu1 %v6810_v5 }
 0x2b8   : > { %6446 = vmatmul.mubr.msk.f32.vlgmr.msra.gmra.mrb[46].mxu1 %vm350_vm4, %v4725_v30 }
 0x2b9   : > { %6596 = vmatpush3.bf16.msra.mxu1 %v7136_v8  ;;  %6457 = vmatprep.mubr.msk.f32.mxu1 %vm6811_vm0, %v6812_v7 }
 0x2ba   : > { %6597 = vmatprep.subr.bf16.mxu1 %v6810_v5 }
 0x2bc   : > { %6458 = vmatmul.mubr.msk.f32.vlgmr.msra.gmra.mrb[48].mxu1 %vm350_vm4, %v4725_v30 }
 0x2bd   : > { %6599 = vmatpush3.bf16.msra.mxu1 %v6921_v6  ;;  %6469 = vmatprep.mubr.msk.f32.mxu1 %vm6811_vm0, %v6812_v7 }
 0x2be   : > { %6600 = vmatprep.subr.bf16.mxu1 %v6810_v5 }
 0x2c0   : > { %6470 = vmatmul.mubr.msk.f32.vlgmr.msra.gmra.mrb[50].mxu1 %vm350_vm4, %v7126_v0 }
 0x2c1   : > { %6602 = vmatpush3.bf16.msra.mxu1 %v7136_v8  ;;  %6481 = vmatprep.mubr.msk.f32.mxu1 %vm6811_vm0, %v6812_v7 }
 0x2c2   : > { %6603 = vmatprep.subr.bf16.mxu1 %v6810_v5 }
 0x2c4   : > { %6482 = vmatmul.mubr.msk.f32.vlgmr.msra.gmra.mrb[52].mxu1 %vm350_vm4, %v7126_v0 }
 0x2c5   : > { %6605 = vmatpush3.bf16.msra.mxu1 %v6921_v6  ;;  %6493 = vmatprep.mubr.msk.f32.mxu1 %vm6811_vm0, %v6812_v7  ;;  %v951_v6 = vunpack.c.0.s8 %v950_v32 }
 0x2c6   : > { %6606 = vmatprep.subr.bf16.mxu1 %v6810_v5 }
 0x2c7   : > { %v7354_v35 = vsub.s32 %v951_v6, %v953_v34 }
 0x2c8   : > { %6494 = vmatmul.mubr.msk.f32.vlgmr.msra.gmra.mrb[54].mxu1 %vm350_vm4, %v5403_v4 }
 0x2c9   : > { %6608 = vmatpush3.bf16.msra.mxu1 %v7136_v8  ;;  %6505 = vmatprep.mubr.msk.f32.mxu1 %vm6811_vm0, %v6812_v7 }
 0x2cc   : > { %6506 = vmatmul.mubr.msk.f32.vlgmr.msra.gmra.mrb[56].mxu1 %vm350_vm4, %v5403_v4 }
 0x333   : > { %v942_v5 = vpop.f32.mrb[0].mxu1 }
 0x334   : > { %v6609_v39 = vadd.f32 %v942_v5, %v7356_v38  ;;  %v6176_v40 = vpop.f32.mrb[1].mxu1 }
 0x336   : > { %v948_v46 = vcombine.high %v6609_v39, %v6609_v39  ;;  %v955_v47 = vrot.slane %v6609_v39, %v7354_v35 }
 0x337   : > { %v1256_v49 = vpop.f32.mrb[4].mxu1 }
 0x338   : > { %v962_v50 = vrot.slane %v948_v46, %v7354_v35  ;;  %v963_v17 = vcombine.high %v955_v47, %v955_v47  ;;  %v971_v51 = vrot.slane %v955_v47, %v7354_v35  ;;  %v6195_v21 = vpop.f32.mrb[5].mxu1  ;;  %6197 = vmatpush3.msk.msra.mxu0 %vm427_vm5, %v1256_v49 }
 0x339   : > { %6199 = vmatmul.mubr.msk.f32.vlgmr.msra.gmra.mrb[8].mxu0 %vm423_vm6, %v7178_v45  ;;  %6208 = vmatprep.subr.mxu0 %v6812_v7 }
 0x33a   : > { %v964_v52 = vcombine.high %v962_v50, %v962_v50  ;;  %v978_v53 = vrot.slane %v962_v50, %v7354_v35  ;;  %v985_v54 = vrot.slane %v963_v17, %v7354_v35  ;;  %v993_v55 = vcombine.high %v971_v51, %v971_v51  ;;  %1006 = vst.msk [vmem:[%s7370_s13] sm:$0x1] %vm1005_vm7, %v971_v51 }
 0x33b   : > { %6210 = vmatprep.mubr.msk.f32.mxu0 %vm6811_vm0, %v6812_v7  ;;  %v1404_v56 = vpop.f32.mrb[6].mxu1 }
 0x33c   : > { %v992_v22 = vrot.slane %v964_v52, %v7354_v35  ;;  %v994_v57 = vcombine.high %v978_v53, %v978_v53  ;;  %v995_v58 = vcombine.high %v985_v54, %v985_v54  ;;  %1007 = vst.msk [vmem:[%s7370_s13 + $0x8] sm:$0x1] %vm1005_vm7, %v985_v54  ;;  %1008 = vst.msk [vmem:[%s7370_s13 + $0x10] sm:$0x1] %vm1005_vm7, %v993_v55  ;;  %v6207_v28 = vpop.f32.mrb[7].mxu1  ;;  %6209 = vmatpush3.msk.msra.mxu0 %vm427_vm5, %v1404_v56 }
 0x33d   : > { %1010 = vst.msk [vmem:[%s7370_s13 + $0x20] sm:$0x1] %vm1005_vm7, %v978_v53  ;;  %6220 = vmatprep.subr.mxu0 %v6812_v7 }
 0x33e   : > { %v996_v23 = vcombine.high %v992_v22, %v992_v22  ;;  %1009 = vst.msk [vmem:[%s7370_s13 + $0x18] sm:$0x1] %vm1005_vm7, %v995_v58  ;;  %1011 = vst.msk [vmem:[%s7370_s13 + $0x28] sm:$0x1] %vm1005_vm7, %v992_v22 }
 0x33f   : > { %1012 = vst.msk [vmem:[%s7370_s13 + $0x30] sm:$0x1] %vm1005_vm7, %v994_v57  ;;  %v1548_v59 = vpop.f32.mrb[8].mxu1 }
 0x340   : > { %1013 = vst.msk [vmem:[%s7370_s13 + $0x38] sm:$0x1] %vm1005_vm7, %v996_v23  ;;  %v6219_v36 = vpop.f32.mrb[9].mxu1 }
 0x341   : > { %6211 = vmatmul.mubr.msk.f32.vlgmr.msra.gmra.mrb[8].mxu0 %vm423_vm6, %v7191_v29 }
 0x342   : > { %6221 = vmatpush3.msk.msra.mxu0 %vm427_vm5, %v1548_v59  ;;  %6222 = vmatprep.mubr.msk.f32.mxu0 %vm6811_vm0, %v6812_v7 }
 0x343   : > { %v1790_v41 = vpop.f32.mrb[10].mxu1  ;;  %6232 = vmatprep.subr.mxu0 %v6812_v7 }
 0x344   : > { %v6231_v42 = vpop.f32.mrb[11].mxu1 }
 0x347   : > { %v1934_v60 = vpop.f32.mrb[12].mxu1 }
 0x348   : > { %v6243_v43 = vpop.f32.mrb[13].mxu1 }
 0x349   : > { %6223 = vmatmul.mubr.msk.f32.vlgmr.msra.gmra.mrb[8].mxu0 %vm423_vm6, %v7202_v25 }
 0x34a   : > { %6233 = vmatpush3.msk.msra.mxu0 %vm427_vm5, %v1790_v41  ;;  %6234 = vmatprep.mubr.msk.f32.mxu0 %vm6811_vm0, %v6812_v7 }
 0x34b   : > { %v2082_v48 = vpop.f32.mrb[14].mxu1  ;;  %6244 = vmatprep.subr.mxu0 %v6812_v7 }
 0x34c   : > { %v6255_v61 = vpop.f32.mrb[15].mxu1 }
 0x34d   : > { %6235 = vmatmul.mubr.msk.f32.vlgmr.msra.gmra.mrb[10].mxu0 %vm423_vm6, %v7155_v10 }
 0x34e   : > { %6245 = vmatpush3.msk.msra.mxu0 %vm427_vm5, %v1934_v60  ;;  %6246 = vmatprep.mubr.msk.f32.mxu0 %vm6811_vm0, %v6812_v7 }
 0x34f   : > { %v2226_v62 = vpop.f32.mrb[16].mxu1  ;;  %6256 = vmatprep.subr.mxu0 %v6812_v7 }
 0x350   : > { %v6267_v63 = vpop.f32.mrb[17].mxu1 }
 0x353   : > { %v2468_v0 = vpop.f32.mrb[18].mxu1 }
 0x354   : > { %v6279_v1 = vpop.f32.mrb[19].mxu1 }
 0x355   : > { %6247 = vmatmul.mubr.msk.f32.vlgmr.msra.gmra.mrb[10].mxu0 %vm423_vm6, %v7178_v45 }
 0x356   : > { %6257 = vmatpush3.msk.msra.mxu0 %vm427_vm5, %v2082_v48  ;;  %6258 = vmatprep.mubr.msk.f32.mxu0 %vm6811_vm0, %v6812_v7 }
 0x357   : > { %v2612_v2 = vpop.f32.mrb[20].mxu1  ;;  %6268 = vmatprep.subr.mxu0 %v6812_v7 }
 0x358   : > { %v6291_v8 = vpop.f32.mrb[21].mxu1 }
 0x35b   : > { %v2760_v9 = vpop.f32.mrb[22].mxu1 }
 0x35c   : > { %v6303_v11 = vpop.f32.mrb[23].mxu1 }
 0x35d   : > { %6259 = vmatmul.mubr.msk.f32.vlgmr.msra.gmra.mrb[10].mxu0 %vm423_vm6, %v7191_v29 }
 0x35e   : > { %6269 = vmatpush3.msk.msra.mxu0 %vm427_vm5, %v2226_v62  ;;  %6270 = vmatprep.mubr.msk.f32.mxu0 %vm6811_vm0, %v6812_v7 }
 0x35f   : > { %v2904_v12 = vpop.f32.mrb[24].mxu1  ;;  %6280 = vmatprep.subr.mxu0 %v6812_v7 }
 0x360   : > { %v6315_v13 = vpop.f32.mrb[25].mxu1 }
 0x363   : > { %v3146_v14 = vpop.f32.mrb[26].mxu1 }
 0x364   : > { %v6327_v15 = vpop.f32.mrb[27].mxu1 }
 0x365   : > { %6271 = vmatmul.mubr.msk.f32.vlgmr.msra.gmra.mrb[10].mxu0 %vm423_vm6, %v7202_v25 }
 0x366   : > { %6281 = vmatpush3.msk.msra.mxu0 %vm427_vm5, %v2468_v0  ;;  %6282 = vmatprep.mubr.msk.f32.mxu0 %vm6811_vm0, %v6812_v7 }
 0x367   : > { %v3290_v16 = vpop.f32.mrb[28].mxu1  ;;  %6292 = vmatprep.subr.mxu0 %v6812_v7 }
 0x368   : > { %v6339_v18 = vpop.f32.mrb[29].mxu1 }
 0x369   : > { %6283 = vmatmul.mubr.msk.f32.vlgmr.msra.gmra.mrb[12].mxu0 %vm423_vm6, %v7155_v10 }
 0x36a   : > { %6293 = vmatpush3.msk.msra.mxu0 %vm427_vm5, %v2612_v2  ;;  %6294 = vmatprep.mubr.msk.f32.mxu0 %vm6811_vm0, %v6812_v7 }
 0x36b   : > { %v3438_v19 = vpop.f32.mrb[30].mxu1  ;;  %6304 = vmatprep.subr.mxu0 %v6812_v7 }
 0x36c   : > { %v6351_v20 = vpop.f32.mrb[31].mxu1 }
 0x36f   : > { %v3582_v24 = vpop.f32.mrb[32].mxu1 }
 0x370   : > { %v6363_v26 = vpop.f32.mrb[33].mxu1 }
 0x371   : > { %6295 = vmatmul.mubr.msk.f32.vlgmr.msra.gmra.mrb[12].mxu0 %vm423_vm6, %v7178_v45 }
 0x372   : > { %6305 = vmatpush3.msk.msra.mxu0 %vm427_vm5, %v2760_v9  ;;  %6306 = vmatprep.mubr.msk.f32.mxu0 %vm6811_vm0, %v6812_v7 }
 0x373   : > { %v3824_v44 = vpop.f32.mrb[34].mxu1  ;;  %6316 = vmatprep.subr.mxu0 %v6812_v7 }
 0x374   : > { %v6375_v37 = vpop.f32.mrb[35].mxu1 }
 0x377   : > { %v3968_v27 = vpop.f32.mrb[36].mxu1 }
 0x378   : > { %v6387_v3 = vpop.f32.mrb[37].mxu1 }
 0x379   : > { %6307 = vmatmul.mubr.msk.f32.vlgmr.msra.gmra.mrb[12].mxu0 %vm423_vm6, %v7191_v29 }
 0x37a   : > { %6317 = vmatpush3.msk.msra.mxu0 %vm427_vm5, %v2904_v12  ;;  %6318 = vmatprep.mubr.msk.f32.mxu0 %vm6811_vm0, %v6812_v7 }
 0x37b   : > { %v4116_v30 = vpop.f32.mrb[38].mxu1  ;;  %6328 = vmatprep.subr.mxu0 %v6812_v7 }
 0x37c   : > { %v6399_v4 = vpop.f32.mrb[39].mxu1 }
 0x37f   : > { %v4260_v31 = vpop.f32.mrb[40].mxu1 }
 0x380   : > { %v6411_v32 = vpop.f32.mrb[41].mxu1 }
 0x381   : > { %6319 = vmatmul.mubr.msk.f32.vlgmr.msra.gmra.mrb[12].mxu0 %vm423_vm6, %v7202_v25 }
 0x382   : > { %6329 = vmatpush3.msk.msra.mxu0 %vm427_vm5, %v3146_v14  ;;  %6330 = vmatprep.mubr.msk.f32.mxu0 %vm6811_vm0, %v6812_v7 }
 0x383   : > { %v4502_v33 = vpop.f32.mrb[42].mxu1  ;;  %6340 = vmatprep.subr.mxu0 %v6812_v7 }
 0x384   : > { %v6423_v6 = vpop.f32.mrb[43].mxu1 }
 0x385   : > { %6331 = vmatmul.mubr.msk.f32.vlgmr.msra.gmra.mrb[14].mxu0 %vm423_vm6, %v7155_v10 }
 0x386   : > { %6341 = vmatpush3.msk.msra.mxu0 %vm427_vm5, %v3290_v16  ;;  %6342 = vmatprep.mubr.msk.f32.mxu0 %vm6811_vm0, %v6812_v7 }
 0x387   : > { %v4646_v34 = vpop.f32.mrb[44].mxu1  ;;  %6352 = vmatprep.subr.mxu0 %v6812_v7 }
 0x388   : > { %v6435_v5 = vpop.f32.mrb[45].mxu1 }
 0x38b   : > { %v4794_v39 = vpop.f32.mrb[46].mxu1 }
 0x38c   : > { %v6447_v40 = vpop.f32.mrb[47].mxu1 }
 0x38d   : > { %6343 = vmatmul.mubr.msk.f32.vlgmr.msra.gmra.mrb[14].mxu0 %vm423_vm6, %v7178_v45 }
 0x38e   : > { %6353 = vmatpush3.msk.msra.mxu0 %vm427_vm5, %v3438_v19  ;;  %6354 = vmatprep.mubr.msk.f32.mxu0 %vm6811_vm0, %v6812_v7 }
 0x38f   : > { %v4938_v46 = vpop.f32.mrb[48].mxu1  ;;  %6364 = vmatprep.subr.mxu0 %v6812_v7 }
 0x390   : > { %v6459_v47 = vpop.f32.mrb[49].mxu1 }
 0x393   : > { %v5180_v49 = vpop.f32.mrb[50].mxu1 }
 0x394   : > { %v6471_v50 = vpop.f32.mrb[51].mxu1 }
 0x395   : > { %6355 = vmatmul.mubr.msk.f32.vlgmr.msra.gmra.mrb[14].mxu0 %vm423_vm6, %v7191_v29 }
 0x396   : > { %6365 = vmatpush3.msk.msra.mxu0 %vm427_vm5, %v3582_v24  ;;  %6366 = vmatprep.mubr.msk.f32.mxu0 %vm6811_vm0, %v6812_v7 }
 0x397   : > { %v5324_v17 = vpop.f32.mrb[52].mxu1  ;;  %6376 = vmatprep.subr.mxu0 %v6812_v7 }
 0x398   : > { %v6483_v51 = vpop.f32.mrb[53].mxu1 }
 0x39b   : > { %v5472_v21 = vpop.f32.mrb[54].mxu1 }
 0x39c   : > { %v6495_v52 = vpop.f32.mrb[55].mxu1 }
 0x39d   : > { %6367 = vmatmul.mubr.msk.f32.vlgmr.msra.gmra.mrb[14].mxu0 %vm423_vm6, %v7202_v25 }
 0x39e   : > { %6377 = vmatpush3.msk.msra.mxu0 %vm427_vm5, %v3824_v44  ;;  %6378 = vmatprep.mubr.msk.f32.mxu0 %vm6811_vm0, %v6812_v7 }
 0x39f   : > { %v5616_v53 = vpop.f32.mrb[56].mxu1  ;;  %6388 = vmatprep.subr.mxu0 %v6812_v7 }
 0x3a0   : > { %v6507_v54 = vpop.f32.mrb[57].mxu1 }
 0x3a1   : > { %6379 = vmatmul.mubr.msk.f32.vlgmr.msra.gmra.mrb[16].mxu0 %vm423_vm6, %v7155_v10 }
 0x3a2   : > { %6389 = vmatpush3.msk.msra.mxu0 %vm427_vm5, %v3968_v27  ;;  %6390 = vmatprep.mubr.msk.f32.mxu0 %vm6811_vm0, %v6812_v7 }
 0x3a3   : > { %6400 = vmatprep.subr.mxu0 %v6812_v7 }
 0x3a9   : > { %6391 = vmatmul.mubr.msk.f32.vlgmr.msra.gmra.mrb[16].mxu0 %vm423_vm6, %v7178_v45 }
 0x3aa   : > { %6401 = vmatpush3.msk.msra.mxu0 %vm427_vm5, %v4116_v30  ;;  %6402 = vmatprep.mubr.msk.f32.mxu0 %vm6811_vm0, %v6812_v7 }
 0x3ab   : > { %6412 = vmatprep.subr.mxu0 %v6812_v7 }
 0x3b1   : > { %6403 = vmatmul.mubr.msk.f32.vlgmr.msra.gmra.mrb[16].mxu0 %vm423_vm6, %v7191_v29 }
 0x3b2   : > { %6413 = vmatpush3.msk.msra.mxu0 %vm427_vm5, %v4260_v31  ;;  %6414 = vmatprep.mubr.msk.f32.mxu0 %vm6811_vm0, %v6812_v7 }
 0x3b3   : > { %6424 = vmatprep.subr.mxu0 %v6812_v7 }
 0x3b9   : > { %6415 = vmatmul.mubr.msk.f32.vlgmr.msra.gmra.mrb[16].mxu0 %vm423_vm6, %v7202_v25 }
 0x3ba   : > { %6425 = vmatpush3.msk.msra.mxu0 %vm427_vm5, %v4502_v33  ;;  %6426 = vmatprep.mubr.msk.f32.mxu0 %vm6811_vm0, %v6812_v7 }
 0x3bb   : > { %6436 = vmatprep.subr.mxu0 %v6812_v7 }
 0x3bd   : > { %6427 = vmatmul.mubr.msk.f32.vlgmr.msra.gmra.mrb[18].mxu0 %vm423_vm6, %v7155_v10 }
 0x3be   : > { %6437 = vmatpush3.msk.msra.mxu0 %vm427_vm5, %v4646_v34  ;;  %6438 = vmatprep.mubr.msk.f32.mxu0 %vm6811_vm0, %v6812_v7 }
 0x3bf   : > { %6448 = vmatprep.subr.mxu0 %v6812_v7 }
 0x3c5   : > { %6439 = vmatmul.mubr.msk.f32.vlgmr.msra.gmra.mrb[18].mxu0 %vm423_vm6, %v7178_v45 }
 0x3c6   : > { %6449 = vmatpush3.msk.msra.mxu0 %vm427_vm5, %v4794_v39  ;;  %6450 = vmatprep.mubr.msk.f32.mxu0 %vm6811_vm0, %v6812_v7 }
 0x3c7   : > { %6460 = vmatprep.subr.mxu0 %v6812_v7 }
 0x3cd   : > { %6451 = vmatmul.mubr.msk.f32.vlgmr.msra.gmra.mrb[18].mxu0 %vm423_vm6, %v7191_v29 }
 0x3ce   : > { %6461 = vmatpush3.msk.msra.mxu0 %vm427_vm5, %v4938_v46  ;;  %6462 = vmatprep.mubr.msk.f32.mxu0 %vm6811_vm0, %v6812_v7 }
 0x3cf   : > { %6472 = vmatprep.subr.mxu0 %v6812_v7 }
 0x3d5   : > { %6463 = vmatmul.mubr.msk.f32.vlgmr.msra.gmra.mrb[18].mxu0 %vm423_vm6, %v7202_v25 }
 0x3d6   : > { %6473 = vmatpush3.msk.msra.mxu0 %vm427_vm5, %v5180_v49  ;;  %6474 = vmatprep.mubr.msk.f32.mxu0 %vm6811_vm0, %v6812_v7 }
 0x3d7   : > { %6484 = vmatprep.subr.mxu0 %v6812_v7 }
 0x3d9   : > { %6475 = vmatmul.mubr.msk.f32.vlgmr.msra.gmra.mrb[20].mxu0 %vm423_vm6, %v7155_v10 }
 0x3da   : > { %6485 = vmatpush3.msk.msra.mxu0 %vm427_vm5, %v5324_v17  ;;  %6486 = vmatprep.mubr.msk.f32.mxu0 %vm6811_vm0, %v6812_v7 }
 0x3db   : > { %6496 = vmatprep.subr.mxu0 %v6812_v7 }
 0x3e1   : > { %6487 = vmatmul.mubr.msk.f32.vlgmr.msra.gmra.mrb[20].mxu0 %vm423_vm6, %v7178_v45 }
 0x3e2   : > { %6497 = vmatpush3.msk.msra.mxu0 %vm427_vm5, %v5472_v21  ;;  %6498 = vmatprep.mubr.msk.f32.mxu0 %vm6811_vm0, %v6812_v7 }
 0x3e3   : > { %6508 = vmatprep.subr.mxu0 %v6812_v7 }
 0x3e9   : > { %6499 = vmatmul.mubr.msk.f32.vlgmr.msra.gmra.mrb[20].mxu0 %vm423_vm6, %v7191_v29 }
 0x3ea   : > { %6509 = vmatpush3.msk.msra.mxu0 %vm427_vm5, %v5616_v53  ;;  %6510 = vmatprep.mubr.msk.f32.mxu0 %vm6811_vm0, %v6812_v7 }
 0x3f1   : > { %6511 = vmatmul.mubr.msk.f32.vlgmr.msra.gmra.mrb[20].mxu0 %vm423_vm6, %v7202_v25 }
 0x41c   : > { %v1621_v10 = vpop.f32.mrb[8].mxu0 }
 0x41d   : > { %v6610_v45 = vadd.f32 %v1621_v10, %v7356_v38  ;;  %v6224_v55 = vpop.f32.mrb[9].mxu0 }
 0x41f   : > { %v1627_v56 = vcombine.high %v6610_v45, %v6610_v45  ;;  %v1634_v22 = vrot.slane %v6610_v45, %v7354_v35 }
 0x421   : > { %v1641_v29 = vrot.slane %v1627_v56, %v7354_v35  ;;  %v1642_v57 = vcombine.high %v1634_v22, %v1634_v22  ;;  %v1650_v7 = vrot.slane %v1634_v22, %v7354_v35 }
 0x423   : > { %v1643_v25 = vcombine.high %v1641_v29, %v1641_v29  ;;  %v1657_v58 = vrot.slane %v1641_v29, %v7354_v35  ;;  %v1664_v28 = vrot.slane %v1642_v57, %v7354_v35  ;;  %v1672_v23 = vcombine.high %v1650_v7, %v1650_v7  ;;  %1684 = vst.msk [vmem:[%s7370_s13 + $0x1] sm:$0x1] %vm1005_vm7, %v1650_v7 }
 0x425   : > { %v1671_v59 = vrot.slane %v1643_v25, %v7354_v35  ;;  %v1673_v36 = vcombine.high %v1657_v58, %v1657_v58  ;;  %v1674_v41 = vcombine.high %v1664_v28, %v1664_v28  ;;  %1685 = vst.msk [vmem:[%s7370_s13 + $0x9] sm:$0x1] %vm1005_vm7, %v1664_v28  ;;  %1686 = vst.msk [vmem:[%s7370_s13 + $0x11] sm:$0x1] %vm1005_vm7, %v1672_v23 }
 0x426   : > { %1688 = vst.msk [vmem:[%s7370_s13 + $0x21] sm:$0x1] %vm1005_vm7, %v1657_v58 }
 0x427   : > { %v1675_v42 = vcombine.high %v1671_v59, %v1671_v59  ;;  %1687 = vst.msk [vmem:[%s7370_s13 + $0x19] sm:$0x1] %vm1005_vm7, %v1674_v41  ;;  %1689 = vst.msk [vmem:[%s7370_s13 + $0x29] sm:$0x1] %vm1005_vm7, %v1671_v59 }
 0x428   : > { %1690 = vst.msk [vmem:[%s7370_s13 + $0x31] sm:$0x1] %vm1005_vm7, %v1673_v36 }
 0x429   : > { %1691 = vst.msk [vmem:[%s7370_s13 + $0x39] sm:$0x1] %vm1005_vm7, %v1675_v42 }
 0x438   : > { %v2299_v60 = vpop.f32.mrb[10].mxu0 }
 0x439   : > { %v6611_v43 = vadd.f32 %v2299_v60, %v7356_v38  ;;  %v6272_v48 = vpop.f32.mrb[11].mxu0 }
 0x43b   : > { %v2305_v61 = vcombine.high %v6611_v43, %v6611_v43  ;;  %v2312_v62 = vrot.slane %v6611_v43, %v7354_v35 }
 0x43d   : > { %v2319_v63 = vrot.slane %v2305_v61, %v7354_v35  ;;  %v2320_v0 = vcombine.high %v2312_v62, %v2312_v62  ;;  %v2328_v1 = vrot.slane %v2312_v62, %v7354_v35 }
 0x43f   : > { %v2321_v2 = vcombine.high %v2319_v63, %v2319_v63  ;;  %v2335_v8 = vrot.slane %v2319_v63, %v7354_v35  ;;  %v2342_v9 = vrot.slane %v2320_v0, %v7354_v35  ;;  %v2350_v11 = vcombine.high %v2328_v1, %v2328_v1  ;;  %2362 = vst.msk [vmem:[%s7370_s13 + $0x2] sm:$0x1] %vm1005_vm7, %v2328_v1 }
 0x441   : > { %v2349_v12 = vrot.slane %v2321_v2, %v7354_v35  ;;  %v2351_v13 = vcombine.high %v2335_v8, %v2335_v8  ;;  %v2352_v14 = vcombine.high %v2342_v9, %v2342_v9  ;;  %2363 = vst.msk [vmem:[%s7370_s13 + $0xa] sm:$0x1] %vm1005_vm7, %v2342_v9  ;;  %2364 = vst.msk [vmem:[%s7370_s13 + $0x12] sm:$0x1] %vm1005_vm7, %v2350_v11 }
 0x442   : > { %2366 = vst.msk [vmem:[%s7370_s13 + $0x22] sm:$0x1] %vm1005_vm7, %v2335_v8 }
 0x443   : > { %v2353_v15 = vcombine.high %v2349_v12, %v2349_v12  ;;  %2365 = vst.msk [vmem:[%s7370_s13 + $0x1a] sm:$0x1] %vm1005_vm7, %v2352_v14  ;;  %2367 = vst.msk [vmem:[%s7370_s13 + $0x2a] sm:$0x1] %vm1005_vm7, %v2349_v12 }
 0x444   : > { %2368 = vst.msk [vmem:[%s7370_s13 + $0x32] sm:$0x1] %vm1005_vm7, %v2351_v13 }
 0x445   : > { %2369 = vst.msk [vmem:[%s7370_s13 + $0x3a] sm:$0x1] %vm1005_vm7, %v2353_v15 }
 0x454   : > { %v2977_v16 = vpop.f32.mrb[12].mxu0 }
 0x455   : > { %v6612_v18 = vadd.f32 %v2977_v16, %v7356_v38  ;;  %v6320_v19 = vpop.f32.mrb[13].mxu0 }
 0x457   : > { %v2983_v20 = vcombine.high %v6612_v18, %v6612_v18  ;;  %v2990_v24 = vrot.slane %v6612_v18, %v7354_v35 }
 0x459   : > { %v2997_v26 = vrot.slane %v2983_v20, %v7354_v35  ;;  %v2998_v44 = vcombine.high %v2990_v24, %v2990_v24  ;;  %v3006_v37 = vrot.slane %v2990_v24, %v7354_v35 }
 0x45b   : > { %v2999_v27 = vcombine.high %v2997_v26, %v2997_v26  ;;  %v3013_v3 = vrot.slane %v2997_v26, %v7354_v35  ;;  %v3020_v30 = vrot.slane %v2998_v44, %v7354_v35  ;;  %v3028_v4 = vcombine.high %v3006_v37, %v3006_v37  ;;  %3040 = vst.msk [vmem:[%s7370_s13 + $0x3] sm:$0x1] %vm1005_vm7, %v3006_v37 }
 0x45d   : > { %v3027_v31 = vrot.slane %v2999_v27, %v7354_v35  ;;  %v3029_v32 = vcombine.high %v3013_v3, %v3013_v3  ;;  %v3030_v33 = vcombine.high %v3020_v30, %v3020_v30  ;;  %3041 = vst.msk [vmem:[%s7370_s13 + $0xb] sm:$0x1] %vm1005_vm7, %v3020_v30  ;;  %3042 = vst.msk [vmem:[%s7370_s13 + $0x13] sm:$0x1] %vm1005_vm7, %v3028_v4 }
 0x45e   : > { %3044 = vst.msk [vmem:[%s7370_s13 + $0x23] sm:$0x1] %vm1005_vm7, %v3013_v3 }
 0x45f   : > { %v3031_v6 = vcombine.high %v3027_v31, %v3027_v31  ;;  %3043 = vst.msk [vmem:[%s7370_s13 + $0x1b] sm:$0x1] %vm1005_vm7, %v3030_v33  ;;  %3045 = vst.msk [vmem:[%s7370_s13 + $0x2b] sm:$0x1] %vm1005_vm7, %v3027_v31 }
 0x460   : > { %3046 = vst.msk [vmem:[%s7370_s13 + $0x33] sm:$0x1] %vm1005_vm7, %v3029_v32 }
 0x461   : > { %3047 = vst.msk [vmem:[%s7370_s13 + $0x3b] sm:$0x1] %vm1005_vm7, %v3031_v6 }
 0x470   : > { %v3655_v34 = vpop.f32.mrb[14].mxu0 }
 0x471   : > { %v6613_v5 = vadd.f32 %v3655_v34, %v7356_v38  ;;  %v6368_v39 = vpop.f32.mrb[15].mxu0 }
 0x473   : > { %v3661_v40 = vcombine.high %v6613_v5, %v6613_v5  ;;  %v3668_v46 = vrot.slane %v6613_v5, %v7354_v35 }
 0x475   : > { %v3675_v47 = vrot.slane %v3661_v40, %v7354_v35  ;;  %v3676_v49 = vcombine.high %v3668_v46, %v3668_v46  ;;  %v3684_v50 = vrot.slane %v3668_v46, %v7354_v35 }
 0x477   : > { %v3677_v17 = vcombine.high %v3675_v47, %v3675_v47  ;;  %v3691_v51 = vrot.slane %v3675_v47, %v7354_v35  ;;  %v3698_v21 = vrot.slane %v3676_v49, %v7354_v35  ;;  %v3706_v52 = vcombine.high %v3684_v50, %v3684_v50  ;;  %3718 = vst.msk [vmem:[%s7370_s13 + $0x4] sm:$0x1] %vm1005_vm7, %v3684_v50 }
 0x479   : > { %v3705_v53 = vrot.slane %v3677_v17, %v7354_v35  ;;  %v3707_v54 = vcombine.high %v3691_v51, %v3691_v51  ;;  %v3708_v10 = vcombine.high %v3698_v21, %v3698_v21  ;;  %3719 = vst.msk [vmem:[%s7370_s13 + $0xc] sm:$0x1] %vm1005_vm7, %v3698_v21  ;;  %3720 = vst.msk [vmem:[%s7370_s13 + $0x14] sm:$0x1] %vm1005_vm7, %v3706_v52 }
 0x47a   : > { %3722 = vst.msk [vmem:[%s7370_s13 + $0x24] sm:$0x1] %vm1005_vm7, %v3691_v51 }
 0x47b   : > { %v3709_v45 = vcombine.high %v3705_v53, %v3705_v53  ;;  %3721 = vst.msk [vmem:[%s7370_s13 + $0x1c] sm:$0x1] %vm1005_vm7, %v3708_v10  ;;  %3723 = vst.msk [vmem:[%s7370_s13 + $0x2c] sm:$0x1] %vm1005_vm7, %v3705_v53 }
 0x47c   : > { %3724 = vst.msk [vmem:[%s7370_s13 + $0x34] sm:$0x1] %vm1005_vm7, %v3707_v54 }
 0x47d   : > { %3725 = vst.msk [vmem:[%s7370_s13 + $0x3c] sm:$0x1] %vm1005_vm7, %v3709_v45 }
 0x48c   : > { %v4333_v55 = vpop.f32.mrb[16].mxu0 }
 0x48d   : > { %v6614_v56 = vadd.f32 %v4333_v55, %v7356_v38  ;;  %v6416_v22 = vpop.f32.mrb[17].mxu0 }
 0x48f   : > { %v4339_v29 = vcombine.high %v6614_v56, %v6614_v56  ;;  %v4346_v57 = vrot.slane %v6614_v56, %v7354_v35 }
 0x491   : > { %v4353_v7 = vrot.slane %v4339_v29, %v7354_v35  ;;  %v4354_v25 = vcombine.high %v4346_v57, %v4346_v57  ;;  %v4362_v58 = vrot.slane %v4346_v57, %v7354_v35 }
 0x493   : > { %v4355_v28 = vcombine.high %v4353_v7, %v4353_v7  ;;  %v4369_v23 = vrot.slane %v4353_v7, %v7354_v35  ;;  %v4376_v59 = vrot.slane %v4354_v25, %v7354_v35  ;;  %v4384_v36 = vcombine.high %v4362_v58, %v4362_v58  ;;  %4396 = vst.msk [vmem:[%s7370_s13 + $0x5] sm:$0x1] %vm1005_vm7, %v4362_v58 }
 0x495   : > { %v4383_v41 = vrot.slane %v4355_v28, %v7354_v35  ;;  %v4385_v42 = vcombine.high %v4369_v23, %v4369_v23  ;;  %v4386_v60 = vcombine.high %v4376_v59, %v4376_v59  ;;  %4397 = vst.msk [vmem:[%s7370_s13 + $0xd] sm:$0x1] %vm1005_vm7, %v4376_v59  ;;  %4398 = vst.msk [vmem:[%s7370_s13 + $0x15] sm:$0x1] %vm1005_vm7, %v4384_v36 }
 0x496   : > { %4400 = vst.msk [vmem:[%s7370_s13 + $0x25] sm:$0x1] %vm1005_vm7, %v4369_v23 }
 0x497   : > { %v4387_v43 = vcombine.high %v4383_v41, %v4383_v41  ;;  %4399 = vst.msk [vmem:[%s7370_s13 + $0x1d] sm:$0x1] %vm1005_vm7, %v4386_v60  ;;  %4401 = vst.msk [vmem:[%s7370_s13 + $0x2d] sm:$0x1] %vm1005_vm7, %v4383_v41 }
 0x498   : > { %4402 = vst.msk [vmem:[%s7370_s13 + $0x35] sm:$0x1] %vm1005_vm7, %v4385_v42 }
 0x499   : > { %4403 = vst.msk [vmem:[%s7370_s13 + $0x3d] sm:$0x1] %vm1005_vm7, %v4387_v43 }
 0x4a8   : > { %v5011_v48 = vpop.f32.mrb[18].mxu0 }
 0x4a9   : > { %v6615_v61 = vadd.f32 %v5011_v48, %v7356_v38  ;;  %v6464_v62 = vpop.f32.mrb[19].mxu0 }
 0x4ab   : > { %v5017_v63 = vcombine.high %v6615_v61, %v6615_v61  ;;  %v5024_v0 = vrot.slane %v6615_v61, %v7354_v35 }
 0x4ad   : > { %v5031_v1 = vrot.slane %v5017_v63, %v7354_v35  ;;  %v5032_v2 = vcombine.high %v5024_v0, %v5024_v0  ;;  %v5040_v8 = vrot.slane %v5024_v0, %v7354_v35 }
 0x4af   : > { %v5033_v9 = vcombine.high %v5031_v1, %v5031_v1  ;;  %v5047_v11 = vrot.slane %v5031_v1, %v7354_v35  ;;  %v5054_v12 = vrot.slane %v5032_v2, %v7354_v35  ;;  %v5062_v13 = vcombine.high %v5040_v8, %v5040_v8  ;;  %5074 = vst.msk [vmem:[%s7370_s13 + $0x6] sm:$0x1] %vm1005_vm7, %v5040_v8 }
 0x4b1   : > { %v5061_v14 = vrot.slane %v5033_v9, %v7354_v35  ;;  %v5063_v15 = vcombine.high %v5047_v11, %v5047_v11  ;;  %v5064_v16 = vcombine.high %v5054_v12, %v5054_v12  ;;  %5075 = vst.msk [vmem:[%s7370_s13 + $0xe] sm:$0x1] %vm1005_vm7, %v5054_v12  ;;  %5076 = vst.msk [vmem:[%s7370_s13 + $0x16] sm:$0x1] %vm1005_vm7, %v5062_v13 }
 0x4b2   : > { %5078 = vst.msk [vmem:[%s7370_s13 + $0x26] sm:$0x1] %vm1005_vm7, %v5047_v11 }
 0x4b3   : > { %v5065_v18 = vcombine.high %v5061_v14, %v5061_v14  ;;  %5077 = vst.msk [vmem:[%s7370_s13 + $0x1e] sm:$0x1] %vm1005_vm7, %v5064_v16  ;;  %5079 = vst.msk [vmem:[%s7370_s13 + $0x2e] sm:$0x1] %vm1005_vm7, %v5061_v14 }
 0x4b4   : > { %5080 = vst.msk [vmem:[%s7370_s13 + $0x36] sm:$0x1] %vm1005_vm7, %v5063_v15 }
 0x4b5   : > { %5081 = vst.msk [vmem:[%s7370_s13 + $0x3e] sm:$0x1] %vm1005_vm7, %v5065_v18 }
 0x4c4   : > { %v5689_v19 = vpop.f32.mrb[20].mxu0 }
 0x4c5   : > { %v6616_v20 = vadd.f32 %v5689_v19, %v7356_v38  ;;  %v6512_v24 = vpop.f32.mrb[21].mxu0 }
 0x4c7   : > { %v5695_v26 = vcombine.high %v6616_v20, %v6616_v20  ;;  %v5702_v44 = vrot.slane %v6616_v20, %v7354_v35 }
 0x4c9   : > { %v5709_v37 = vrot.slane %v5695_v26, %v7354_v35  ;;  %v5710_v27 = vcombine.high %v5702_v44, %v5702_v44  ;;  %v5718_v3 = vrot.slane %v5702_v44, %v7354_v35 }
 0x4cb   : > { %v5711_v30 = vcombine.high %v5709_v37, %v5709_v37  ;;  %v5725_v4 = vrot.slane %v5709_v37, %v7354_v35  ;;  %v5732_v31 = vrot.slane %v5710_v27, %v7354_v35  ;;  %v5740_v38 = vcombine.high %v5718_v3, %v5718_v3  ;;  %5752 = vst.msk [vmem:[%s7370_s13 + $0x7] sm:$0x1] %vm1005_vm7, %v5718_v3 }
 0x4cd   : > { %v5739_v32 = vrot.slane %v5711_v30, %v7354_v35  ;;  %v5741_v33 = vcombine.high %v5725_v4, %v5725_v4  ;;  %v5742_v6 = vcombine.high %v5732_v31, %v5732_v31  ;;  %5753 = vst.msk [vmem:[%s7370_s13 + $0xf] sm:$0x1] %vm1005_vm7, %v5732_v31  ;;  %5754 = vst.msk [vmem:[%s7370_s13 + $0x17] sm:$0x1] %vm1005_vm7, %v5740_v38 }
 0x4ce   : > { %5756 = vst.msk [vmem:[%s7370_s13 + $0x27] sm:$0x1] %vm1005_vm7, %v5725_v4 }
 0x4cf   : > { %v5743_v35 = vcombine.high %v5739_v32, %v5739_v32  ;;  %5755 = vst.msk [vmem:[%s7370_s13 + $0x1f] sm:$0x1] %vm1005_vm7, %v5742_v6  ;;  %5757 = vst.msk [vmem:[%s7370_s13 + $0x2f] sm:$0x1] %vm1005_vm7, %v5739_v32 }
 0x4d0   : > { %5758 = vst.msk [vmem:[%s7370_s13 + $0x37] sm:$0x1] %vm1005_vm7, %v5741_v33 }
 0x4d1   : > { %5759 = vst.msk [vmem:[%s7370_s13 + $0x3f] sm:$0x1] %vm1005_vm7, %v5743_v35 }
 0x4d2   : > { %6742 = shalt.err (!%p6739_p5)
}
 0x4d3   : > { %s6743_s30 = scalar_lea.hbm %s7702_s18, 1024  ;;  %s6747_s12 = scalar_lea.hbm %s7768_s6, 2048 }
 0x4d4   : > { %p6744_p6 = scmp.ne.s32.totalorder %s7702_s18, %s6743_s30  ;;  %p6748_p10 = scmp.lt.u32.totalorder %s7702_s18, %s7768_s6 }
 0x4d5   : > { %p6749_p11 = scmp.lt.u32.totalorder %s6747_s12, %s6743_s30  ;;  %p6751_p13 = scmp.lt.u32.totalorder %s6743_s30, %s7702_s18 }
 0x4d6   : > { %p6745_p7 = pnand %p6744_p6, %p6893_p4 }
 0x4d7   : > { %p6750_p12 = por %p6749_p11, %p6748_p10 }
 0x4d8   : > { %p6746_p9 = pneg %p6745_p7 }
 0x4d9   : > { %p6752_p0 = por %p6751_p13, %p6750_p12 }
 0x4db   : > { %p6753_p1 = pnand %p6752_p0, %p6746_p9 }
 0x4dd   : > { %6756 = shalt.err (!%p6753_p1)
}
 0x4de   : > { %s6816_s16 = smov 128   ;;  %s6817_s17 = smov 8  }
 0x4df   : > { %6665 = dma.vmem_to_hbm [thread:$0]  (%p6893_p4), %s7704_s15, 1024, %s7702_s18, %s7716_s24, %s6816_s16, %s6816_s16, %s6817_s17  }
 0x4e0 PF: > { %p6671_p2 = scmp.ge.s32.totalorder %s6807_s26, 2  ;;  %s5790_s19 = sand.u32 1, %s6787_s21  }
 0x4e1   : > { %s5791_s20 = scalar_lea.sflag [#allocation3], %s5790_s19 }
 0x4e2   : > { %p6668_p3 = pnand %p6671_p2, %p6900_p8 }
 0x4e4   : > { %6782 = dma.done.wait (!%p6668_p3), %s5791_s20, 1024  }
 0x4e5   : > { %6784 = vsyncadd (!%p6668_p3), %s5791_s20, 4294966272  ;;  %s19_s26 = sadd.s32 1, %s6807_s26   ;;  %s7771_s21 = smov %s6791_s22 }
 0x4e6   : > { %p16_p5 = scmp.ge.s32.totalorder %s19_s26, 4   ;;  %s7772_s22 = smov %s6795_s23 }
 0x4e7   : > { %s7773_s23 = smov %s6906_s10  ;;  %s7774_s24 = smov %s6803_s25 }
 0x4e8   : > { %s7775_s25 = smov %s7777_s29  ;;  %18 = sbr.rel (!%p16_p5) target bundleno = 4 (0x4), region = 83 }
 0x4ef   :  { %5796 = vsyncpa [#allocation3], 1 }
 0x4f0   :  { %5798 = vsyncpa [#allocation3 + $0x1], 1 }

</bundles_post_ra>
